<compile_context>
chip_gen: v7x
topology: tpu7x:2x2x1
jax: 0.10.0
libtpu: 0.0.40
codegen_flags: <defaults>
</compile_context>

<pallas_src>
import jax
import jax.numpy as jnp
from jax.experimental import pallas as pl
from jax.experimental.pallas import tpu as pltpu


def _round_up(x, m):
    return ((x + m - 1) // m) * m


def _discriminator_kernel(x_ref, w1_ref, b1_ref, w2_ref, b2_ref, w3_ref, b3_ref,
                          o_ref):
    """Fused 3-layer MLP for one batch tile.

    Weights/biases are whole (padded) arrays kept VMEM-resident (single
    buffer) across the batch grid; only the x / out tiles stream.  Matmuls
    accumulate in f32.
    """
    x = x_ref[...]

    # Layer 1: Linear + LeakyReLU(0.2)
    h = jnp.dot(x, w1_ref[...], preferred_element_type=jnp.float32) + b1_ref[...]
    h = jnp.maximum(h, 0.2 * h)

    # Layer 2: Linear + LeakyReLU(0.2)  (cast back to the MXU operand dtype)
    h = jnp.dot(h.astype(w2_ref.dtype), w2_ref[...],
                preferred_element_type=jnp.float32) + b2_ref[...]
    h = jnp.maximum(h, 0.2 * h)

    # Layer 3: Linear (out_dim padded to a full 128-lane block) + Sigmoid.
    h = jnp.dot(h.astype(w3_ref.dtype), w3_ref[...],
                preferred_element_type=jnp.float32) + b3_ref[...]

    # Exact f32 sigmoid: exp lowers to the EUP (otherwise-idle slot); the
    # divide is only (tile_b, out_p) elements so it stays off the VALU path.
    o_ref[...] = (1.0 / (1.0 + jnp.exp(-h))).astype(o_ref.dtype)


def _vmem_capacity_bytes():
    """Physical per-core VMEM (128 MiB v5e/v6e, 64 MiB v7x); safe fallback."""
    try:
        return int(pltpu.get_tpu_info().vmem_capacity_bytes)
    except Exception:
        return 64 * 1024 * 1024  # conservative (v7x per-TC)


def prepare_discriminator_params(params, compute_dtype=jnp.bfloat16):
    """One-time pad + cast of weights/biases to lane-aligned (128) shapes.

    Call once (at init / after each optimizer step), NOT per forward: padding
    every call re-reads and re-writes all weights in HBM for no benefit.
    Weights are cast to `compute_dtype` (bf16 default, MXU-native); biases
    stay f32.  Zero padding is exact for this MLP.
    """
    f32 = jnp.float32
    cdt = jnp.dtype(compute_dtype)
    w1, b1 = params["w1"], params["b1"]
    w2, b2 = params["w2"], params["b2"]
    w3, b3 = params["w3"], params["b3"]

    d_in, hidden = w1.shape
    out_dim = w3.shape[1]
    d_in_p = _round_up(d_in, 128)
    hid_p = _round_up(hidden, 128)
    out_p = _round_up(out_dim, 128)

    def pad2(a, rows, cols, dt):
        a = a.astype(dt)
        if a.shape == (rows, cols):
            return a
        return jnp.zeros((rows, cols), dt).at[:a.shape[0], :a.shape[1]].set(a)

    return {
        "w1": pad2(w1, d_in_p, hid_p, cdt), "b1": pad2(b1, 1, hid_p, f32),
        "w2": pad2(w2, hid_p, hid_p, cdt), "b2": pad2(b2, 1, hid_p, f32),
        "w3": pad2(w3, hid_p, out_p, cdt), "b3": pad2(b3, 1, out_p, f32),
        "dims": (int(d_in), int(hidden), int(out_dim)),
        "compute_dtype": cdt,
    }


def discriminator_forward(x, prepped, *, tile_b=None):
    """x: (B, input_dim) -> (B, output_dim) float32 in [0, 1].

    `prepped` comes from prepare_discriminator_params().  Note: with the
    default bf16 compute dtype, x is quantized to bf16 before layer 1
    (documented; matmuls still accumulate in f32).
    """
    f32 = jnp.float32
    d_in, hidden, out_dim = prepped["dims"]
    cdt = prepped["compute_dtype"]
    w1_p, b1_p = prepped["w1"], prepped["b1"]
    w2_p, b2_p = prepped["w2"], prepped["b2"]
    w3_p, b3_p = prepped["w3"], prepped["b3"]
    d_in_p, hid_p = w1_p.shape
    out_p = w3_p.shape[1]

    B = x.shape[0]
    assert x.shape[1] == d_in, (x.shape, d_in)

    def nbytes(a):
        return int(a.size) * jnp.dtype(a.dtype).itemsize

    resident_bytes = sum(nbytes(a) for a in (w1_p, b1_p, w2_p, b2_p, w3_p, b3_p))
    itemsize = jnp.dtype(cdt).itemsize

    # Generation-aware VMEM budget (~112 MiB usable on v5e/v6e, ~56 MiB v7x).
    vmem_cap = max(32 * 1024 * 1024, (_vmem_capacity_bytes() * 7) // 8)

    def step_bytes(t):
        # double-buffered x/out tiles + f32 (t, hid_p) intermediates
        return 2 * t * d_in_p * itemsize + 2 * t * out_p * 4 + 2 * t * hid_p * 4

    if tile_b is None:
        budget = vmem_cap - resident_bytes - (4 << 20)
        cands = [t for t in (1024, 512, 256, 128) if step_bytes(t) <= budget]
        cands = cands or [128]
        # Keep >= 2 grid steps for big batches so v7x's two TensorCores both
        # get work (one harmless extra step on single-TC v5e/v6e).
        multi = [t for t in cands if pl.cdiv(B, t) >= 2]
        cands = multi or cands
        # Minimize batch padding; tie-break toward the larger tile.
        tile_b = min(cands, key=lambda t: (_round_up(B, t), -t))

    b_p = _round_up(B, tile_b)
    num_tiles = b_p // tile_b

    # Only x is prepped per call; skip the pad copy when shapes already align.
    x_c = x if x.dtype == cdt else x.astype(cdt)
    if (B, d_in) == (b_p, d_in_p):
        x_p = x_c
    else:
        x_p = jnp.zeros((b_p, d_in_p), cdt).at[:B, :d_in].set(x_c)

    # Generous limit (covers the double-buffered fallback path), capped below
    # physical VMEM.  For small models this floors at 32 MiB.
    vmem_limit = int(min(vmem_cap,
                         max(32 * 1024 * 1024,
                             2 * resident_bytes + step_bytes(tile_b) + (8 << 20))))

    flops = 2 * b_p * (d_in_p * hid_p + hid_p * hid_p + hid_p * out_p)
    bytes_accessed = nbytes(x_p) + resident_bytes + b_p * out_p * 4

    x_spec = pl.BlockSpec((tile_b, d_in_p), lambda i: (i, 0))
    out_spec = pl.BlockSpec((tile_b, out_p), lambda i: (i, 0))

    def resident_spec(shape, single_buffer):
        if single_buffer:
            # Constant index_map -> one VMEM buffer is enough; halves the
            # resident weight footprint vs the default double buffer.
            return pl.BlockSpec(shape, lambda i: (0, 0),
                                pipeline_mode=pl.Buffered(1))
        return pl.BlockSpec(shape, lambda i: (0, 0))

    def run(single_buffer):
        return pl.pallas_call(
            _discriminator_kernel,
            out_shape=jax.ShapeDtypeStruct((b_p, out_p), f32),
            grid=(num_tiles,),
            in_specs=[
                x_spec,
                resident_spec((d_in_p, hid_p), single_buffer),
                resident_spec((1, hid_p), single_buffer),
                resident_spec((hid_p, hid_p), single_buffer),
                resident_spec((1, hid_p), single_buffer),
                resident_spec((hid_p, out_p), single_buffer),
                resident_spec((1, out_p), single_buffer),
            ],
            out_specs=out_spec,
            compiler_params=pltpu.CompilerParams(
                dimension_semantics=("parallel",),   # megacore-shard batch on v7x
                vmem_limit_bytes=vmem_limit),
            cost_estimate=pl.CostEstimate(
                flops=flops,
                transcendentals=b_p * out_p,
                bytes_accessed=bytes_accessed),
        )(x_p, w1_p, b1_p, w2_p, b2_p, w3_p, b3_p)

    try:
        out = run(single_buffer=True)
    except Exception:
        # pipeline_mode=pl.Buffered(1) unsupported on this Pallas build ->
        # fall back to default (double-buffered) resident weights.
        out = run(single_buffer=False)

    return out[:B, :out_dim]


def init_discriminator_params(key, input_dim, hidden_dim, output_dim=1):
    """Deterministic init mimicking nn.Linear's U(-1/sqrt(in), 1/sqrt(in))."""
    def linear(k, fan_in, fan_out):
        kw, kb = jax.random.split(k)
        bound = 1.0 / jnp.sqrt(fan_in)
        # stored already transposed: (in, out)
        w = jax.random.uniform(kw, (fan_in, fan_out), jnp.float32, -bound, bound)
        b = jax.random.uniform(kb, (1, fan_out), jnp.float32, -bound, bound)
        return w, b

    k1, k2, k3 = jax.random.split(key, 3)
    w1, b1 = linear(k1, input_dim, hidden_dim)
    w2, b2 = linear(k2, hidden_dim, hidden_dim)
    w3, b3 = linear(k3, hidden_dim, output_dim)
    return {"w1": w1, "b1": b1, "w2": w2, "b2": b2, "w3": w3, "b3": b3}


def _reference_forward(x, p):
    h = x @ p["w1"] + p["b1"]
    h = jnp.where(h > 0, h, 0.2 * h)
    h = h @ p["w2"] + p["b2"]
    h = jnp.where(h > 0, h, 0.2 * h)
    h = h @ p["w3"] + p["b3"]
    return jax.nn.sigmoid(h)


if __name__ == "__main__":
    key = jax.random.PRNGKey(0)
    kx, kp, kx2, kp2 = jax.random.split(key, 4)

    # --- Test 1: module defaults (output_dim=1), default bf16 MXU operands ---
    batch, input_dim, hidden_dim, output_dim = 8, 16, 32, 1
    x = jax.random.normal(kx, (batch, input_dim), jnp.float32)
    params = init_discriminator_params(kp, input_dim, hidden_dim, output_dim)
    ref = _reference_forward(x, params)

    prepped_bf16 = prepare_discriminator_params(params)          # bf16 default
    out_bf16 = jax.block_until_ready(discriminator_forward(x, prepped_bf16))
    assert out_bf16.shape == (batch, output_dim)
    assert jnp.allclose(out_bf16, ref, atol=3e-2, rtol=3e-2)

    # --- Test 2: f32 operand path, tight tolerance ---
    prepped_f32 = prepare_discriminator_params(params, compute_dtype=jnp.float32)
    out_f32 = jax.block_until_ready(discriminator_forward(x, prepped_f32))
    assert out_f32.shape == (batch, output_dim)
    assert jnp.allclose(out_f32, ref, atol=1e-5, rtol=1e-5)

    # --- Test 3: multi-tile batch grid + output_dim > 1 (f32, tight) ---
    batch2, output_dim2 = 300, 3
    x2 = jax.random.normal(kx2, (batch2, input_dim), jnp.float32)
    params2 = init_discriminator_params(kp2, input_dim, hidden_dim, output_dim2)
    prepped2 = prepare_discriminator_params(params2, compute_dtype=jnp.float32)
    out2 = jax.block_until_ready(discriminator_forward(x2, prepped2))
    ref2 = _reference_forward(x2, params2)
    assert out2.shape == (batch2, output_dim2)
    assert jnp.allclose(out2, ref2, atol=1e-5, rtol=1e-5)

    print("KERNEL_OK")
</pallas_src>

<mosaic_0001>
module attributes {stable_mosaic.version = 11 : i64} {
  func.func @_discriminator_kernel(%arg0: i32, %arg1: memref<128x128xbf16, #tpu.memory_space<vmem>>, %arg2: memref<128x128xbf16, #tpu.memory_space<vmem>>, %arg3: memref<1x128xf32, #tpu.memory_space<vmem>>, %arg4: memref<128x128xbf16, #tpu.memory_space<vmem>>, %arg5: memref<1x128xf32, #tpu.memory_space<vmem>>, %arg6: memref<128x128xbf16, #tpu.memory_space<vmem>>, %arg7: memref<1x128xf32, #tpu.memory_space<vmem>>, %arg8: memref<128x128xf32, #tpu.memory_space<vmem>>) attributes {dimension_semantics = [#tpu.dimension_semantics<parallel>], iteration_bounds = array<i64: 1>, scalar_prefetch = 0 : i64, scratch_operands = 0 : i64, tpu.core_type = #tpu.core_type<tc>, window_params = [{transform_indices = @transform_0, window_bounds = array<i64: 128, 128>}, {pipeline_mode = #tpu.pipeline_mode<synchronous>, transform_indices = @transform_1, window_bounds = array<i64: 128, 128>}, {pipeline_mode = #tpu.pipeline_mode<synchronous>, transform_indices = @transform_2, window_bounds = array<i64: 1, 128>}, {pipeline_mode = #tpu.pipeline_mode<synchronous>, transform_indices = @transform_3, window_bounds = array<i64: 128, 128>}, {pipeline_mode = #tpu.pipeline_mode<synchronous>, transform_indices = @transform_4, window_bounds = array<i64: 1, 128>}, {pipeline_mode = #tpu.pipeline_mode<synchronous>, transform_indices = @transform_5, window_bounds = array<i64: 128, 128>}, {pipeline_mode = #tpu.pipeline_mode<synchronous>, transform_indices = @transform_6, window_bounds = array<i64: 1, 128>}, {transform_indices = @transform_7, window_bounds = array<i64: 128, 128>}]} {
    %c0 = arith.constant 0 : index
    %c0_0 = arith.constant 0 : index
    %0 = vector.load %arg1[%c0, %c0_0] : memref<128x128xbf16, #tpu.memory_space<vmem>>, vector<128x128xbf16>
    %c0_1 = arith.constant 0 : index
    %c0_2 = arith.constant 0 : index
    %1 = vector.load %arg2[%c0_1, %c0_2] : memref<128x128xbf16, #tpu.memory_space<vmem>>, vector<128x128xbf16>
    %cst = arith.constant dense<0.000000e+00> : vector<128x128xf32>
    %2 = tpu.matmul %0, %1, %cst {dimension_numbers = #tpu.dot_dimension_numbers<[1], [0], [0], [1], [0, 0, 1, 1], [], []>} : vector<128x128xbf16>, vector<128x128xbf16>, vector<128x128xf32> -> vector<128x128xf32>
    %c0_3 = arith.constant 0 : index
    %c0_4 = arith.constant 0 : index
    %3 = vector.load %arg3[%c0_3, %c0_4] : memref<1x128xf32, #tpu.memory_space<vmem>>, vector<1x128xf32>
    %4 = vector.broadcast %3 : vector<1x128xf32> to vector<128x128xf32>
    %5 = arith.addf %2, %4 : vector<128x128xf32>
    %cst_5 = arith.constant 2.000000e-01 : f32
    %6 = vector.broadcast %cst_5 : f32 to vector<128x128xf32>
    %7 = arith.mulf %6, %5 : vector<128x128xf32>
    %8 = arith.maximumf %5, %7 : vector<128x128xf32>
    %9 = arith.truncf %8 : vector<128x128xf32> to vector<128x128xbf16>
    %c0_6 = arith.constant 0 : index
    %c0_7 = arith.constant 0 : index
    %10 = vector.load %arg4[%c0_6, %c0_7] : memref<128x128xbf16, #tpu.memory_space<vmem>>, vector<128x128xbf16>
    %cst_8 = arith.constant dense<0.000000e+00> : vector<128x128xf32>
    %11 = tpu.matmul %9, %10, %cst_8 {dimension_numbers = #tpu.dot_dimension_numbers<[1], [0], [0], [1], [0, 0, 1, 1], [], []>} : vector<128x128xbf16>, vector<128x128xbf16>, vector<128x128xf32> -> vector<128x128xf32>
    %c0_9 = arith.constant 0 : index
    %c0_10 = arith.constant 0 : index
    %12 = vector.load %arg5[%c0_9, %c0_10] : memref<1x128xf32, #tpu.memory_space<vmem>>, vector<1x128xf32>
    %13 = vector.broadcast %12 : vector<1x128xf32> to vector<128x128xf32>
    %14 = arith.addf %11, %13 : vector<128x128xf32>
    %cst_11 = arith.constant 2.000000e-01 : f32
    %15 = vector.broadcast %cst_11 : f32 to vector<128x128xf32>
    %16 = arith.mulf %15, %14 : vector<128x128xf32>
    %17 = arith.maximumf %14, %16 : vector<128x128xf32>
    %18 = arith.truncf %17 : vector<128x128xf32> to vector<128x128xbf16>
    %c0_12 = arith.constant 0 : index
    %c0_13 = arith.constant 0 : index
    %19 = vector.load %arg6[%c0_12, %c0_13] : memref<128x128xbf16, #tpu.memory_space<vmem>>, vector<128x128xbf16>
    %cst_14 = arith.constant dense<0.000000e+00> : vector<128x128xf32>
    %20 = tpu.matmul %18, %19, %cst_14 {dimension_numbers = #tpu.dot_dimension_numbers<[1], [0], [0], [1], [0, 0, 1, 1], [], []>} : vector<128x128xbf16>, vector<128x128xbf16>, vector<128x128xf32> -> vector<128x128xf32>
    %c0_15 = arith.constant 0 : index
    %c0_16 = arith.constant 0 : index
    %21 = vector.load %arg7[%c0_15, %c0_16] : memref<1x128xf32, #tpu.memory_space<vmem>>, vector<1x128xf32>
    %22 = vector.broadcast %21 : vector<1x128xf32> to vector<128x128xf32>
    %23 = arith.addf %20, %22 : vector<128x128xf32>
    %cst_17 = arith.constant 0.000000e+00 : f32
    %24 = vector.broadcast %cst_17 : f32 to vector<128x128xf32>
    %25 = arith.subf %24, %23 : vector<128x128xf32>
    %26 = math.exp %25 : vector<128x128xf32>
    %cst_18 = arith.constant 1.000000e+00 : f32
    %27 = vector.broadcast %cst_18 : f32 to vector<128x128xf32>
    %28 = arith.addf %27, %26 : vector<128x128xf32>
    %cst_19 = arith.constant 1.000000e+00 : f32
    %29 = vector.broadcast %cst_19 : f32 to vector<128x128xf32>
    %30 = arith.divf %29, %28 : vector<128x128xf32>
    %c0_20 = arith.constant 0 : index
    %c0_21 = arith.constant 0 : index
    %31 = vector.load %arg8[%c0_20, %c0_21] : memref<128x128xf32, #tpu.memory_space<vmem>>, vector<128x128xf32>
    tpu.vector_store %arg8[%c0_20, %c0_21], %30 {strides = array<i32>} : memref<128x128xf32, #tpu.memory_space<vmem>>, vector<128x128xf32>,
    return
  }
  func.func @transform_0(%arg0: i32) -> (i32, i32) {
    %c0_i32 = arith.constant 0 : i32
    %c0_i32_0 = arith.constant 0 : i32
    return %arg0, %c0_i32 : i32, i32
  }
  func.func @transform_1(%arg0: i32) -> (i32, i32) {
    %c0_i32 = arith.constant 0 : i32
    %c0_i32_0 = arith.constant 0 : i32
    %c0_i32_1 = arith.constant 0 : i32
    return %c0_i32, %c0_i32_0 : i32, i32
  }
  func.func @transform_2(%arg0: i32) -> (i32, i32) {
    %c0_i32 = arith.constant 0 : i32
    %c0_i32_0 = arith.constant 0 : i32
    %c0_i32_1 = arith.constant 0 : i32
    return %c0_i32, %c0_i32_0 : i32, i32
  }
  func.func @transform_3(%arg0: i32) -> (i32, i32) {
    %c0_i32 = arith.constant 0 : i32
    %c0_i32_0 = arith.constant 0 : i32
    %c0_i32_1 = arith.constant 0 : i32
    return %c0_i32, %c0_i32_0 : i32, i32
  }
  func.func @transform_4(%arg0: i32) -> (i32, i32) {
    %c0_i32 = arith.constant 0 : i32
    %c0_i32_0 = arith.constant 0 : i32
    %c0_i32_1 = arith.constant 0 : i32
    return %c0_i32, %c0_i32_0 : i32, i32
  }
  func.func @transform_5(%arg0: i32) -> (i32, i32) {
    %c0_i32 = arith.constant 0 : i32
    %c0_i32_0 = arith.constant 0 : i32
    %c0_i32_1 = arith.constant 0 : i32
    return %c0_i32, %c0_i32_0 : i32, i32
  }
  func.func @transform_6(%arg0: i32) -> (i32, i32) {
    %c0_i32 = arith.constant 0 : i32
    %c0_i32_0 = arith.constant 0 : i32
    %c0_i32_1 = arith.constant 0 : i32
    return %c0_i32, %c0_i32_0 : i32, i32
  }
  func.func @transform_7(%arg0: i32) -> (i32, i32) {
    %c0_i32 = arith.constant 0 : i32
    %c0_i32_0 = arith.constant 0 : i32
    return %arg0, %c0_i32 : i32, i32
  }
}

module attributes {stable_mosaic.version = 11 : i64} {
  func.func @_discriminator_kernel(%arg0: i32, %arg1: memref<128x128xbf16, #tpu.memory_space<vmem>>, %arg2: memref<128x128xbf16, #tpu.memory_space<vmem>>, %arg3: memref<1x128xf32, #tpu.memory_space<vmem>>, %arg4: memref<128x128xbf16, #tpu.memory_space<vmem>>, %arg5: memref<1x128xf32, #tpu.memory_space<vmem>>, %arg6: memref<128x128xbf16, #tpu.memory_space<vmem>>, %arg7: memref<1x128xf32, #tpu.memory_space<vmem>>, %arg8: memref<128x128xf32, #tpu.memory_space<vmem>>) attributes {dimension_semantics = [#tpu.dimension_semantics<parallel>], iteration_bounds = array<i64: 1>, scalar_prefetch = 0 : i64, scratch_operands = 0 : i64, tpu.core_type = #tpu.core_type<tc>, window_params = [{transform_indices = @transform_0, window_bounds = array<i64: 128, 128>}, {pipeline_mode = #tpu.pipeline_mode<synchronous>, transform_indices = @transform_1, window_bounds = array<i64: 128, 128>}, {pipeline_mode = #tpu.pipeline_mode<synchronous>, transform_indices = @transform_2, window_bounds = array<i64: 1, 128>}, {pipeline_mode = #tpu.pipeline_mode<synchronous>, transform_indices = @transform_3, window_bounds = array<i64: 128, 128>}, {pipeline_mode = #tpu.pipeline_mode<synchronous>, transform_indices = @transform_4, window_bounds = array<i64: 1, 128>}, {pipeline_mode = #tpu.pipeline_mode<synchronous>, transform_indices = @transform_5, window_bounds = array<i64: 128, 128>}, {pipeline_mode = #tpu.pipeline_mode<synchronous>, transform_indices = @transform_6, window_bounds = array<i64: 1, 128>}, {transform_indices = @transform_7, window_bounds = array<i64: 128, 128>}]} {
    %c0 = arith.constant 0 : index
    %c0_0 = arith.constant 0 : index
    %0 = vector.load %arg1[%c0, %c0_0] : memref<128x128xbf16, #tpu.memory_space<vmem>>, vector<128x128xbf16>
    %c0_1 = arith.constant 0 : index
    %c0_2 = arith.constant 0 : index
    %1 = vector.load %arg2[%c0_1, %c0_2] : memref<128x128xbf16, #tpu.memory_space<vmem>>, vector<128x128xbf16>
    %cst = arith.constant dense<0.000000e+00> : vector<128x128xf32>
    %2 = tpu.matmul %0, %1, %cst {dimension_numbers = #tpu.dot_dimension_numbers<[1], [0], [0], [1], [0, 0, 1, 1], [], []>} : vector<128x128xbf16>, vector<128x128xbf16>, vector<128x128xf32> -> vector<128x128xf32>
    %c0_3 = arith.constant 0 : index
    %c0_4 = arith.constant 0 : index
    %3 = vector.load %arg3[%c0_3, %c0_4] : memref<1x128xf32, #tpu.memory_space<vmem>>, vector<1x128xf32>
    %4 = vector.broadcast %3 : vector<1x128xf32> to vector<128x128xf32>
    %5 = arith.addf %2, %4 : vector<128x128xf32>
    %cst_5 = arith.constant 2.000000e-01 : f32
    %6 = vector.broadcast %cst_5 : f32 to vector<128x128xf32>
    %7 = arith.mulf %6, %5 : vector<128x128xf32>
    %8 = arith.maximumf %5, %7 : vector<128x128xf32>
    %9 = arith.truncf %8 : vector<128x128xf32> to vector<128x128xbf16>
    %c0_6 = arith.constant 0 : index
    %c0_7 = arith.constant 0 : index
    %10 = vector.load %arg4[%c0_6, %c0_7] : memref<128x128xbf16, #tpu.memory_space<vmem>>, vector<128x128xbf16>
    %cst_8 = arith.constant dense<0.000000e+00> : vector<128x128xf32>
    %11 = tpu.matmul %9, %10, %cst_8 {dimension_numbers = #tpu.dot_dimension_numbers<[1], [0], [0], [1], [0, 0, 1, 1], [], []>} : vector<128x128xbf16>, vector<128x128xbf16>, vector<128x128xf32> -> vector<128x128xf32>
    %c0_9 = arith.constant 0 : index
    %c0_10 = arith.constant 0 : index
    %12 = vector.load %arg5[%c0_9, %c0_10] : memref<1x128xf32, #tpu.memory_space<vmem>>, vector<1x128xf32>
    %13 = vector.broadcast %12 : vector<1x128xf32> to vector<128x128xf32>
    %14 = arith.addf %11, %13 : vector<128x128xf32>
    %cst_11 = arith.constant 2.000000e-01 : f32
    %15 = vector.broadcast %cst_11 : f32 to vector<128x128xf32>
    %16 = arith.mulf %15, %14 : vector<128x128xf32>
    %17 = arith.maximumf %14, %16 : vector<128x128xf32>
    %18 = arith.truncf %17 : vector<128x128xf32> to vector<128x128xbf16>
    %c0_12 = arith.constant 0 : index
    %c0_13 = arith.constant 0 : index
    %19 = vector.load %arg6[%c0_12, %c0_13] : memref<128x128xbf16, #tpu.memory_space<vmem>>, vector<128x128xbf16>
    %cst_14 = arith.constant dense<0.000000e+00> : vector<128x128xf32>
    %20 = tpu.matmul %18, %19, %cst_14 {dimension_numbers = #tpu.dot_dimension_numbers<[1], [0], [0], [1], [0, 0, 1, 1], [], []>} : vector<128x128xbf16>, vector<128x128xbf16>, vector<128x128xf32> -> vector<128x128xf32>
    %c0_15 = arith.constant 0 : index
    %c0_16 = arith.constant 0 : index
    %21 = vector.load %arg7[%c0_15, %c0_16] : memref<1x128xf32, #tpu.memory_space<vmem>>, vector<1x128xf32>
    %22 = vector.broadcast %21 : vector<1x128xf32> to vector<128x128xf32>
    %23 = arith.addf %20, %22 : vector<128x128xf32>
    %cst_17 = arith.constant 0.000000e+00 : f32
    %24 = vector.broadcast %cst_17 : f32 to vector<128x128xf32>
    %25 = arith.subf %24, %23 : vector<128x128xf32>
    %26 = math.exp %25 : vector<128x128xf32>
    %cst_18 = arith.constant 1.000000e+00 : f32
    %27 = vector.broadcast %cst_18 : f32 to vector<128x128xf32>
    %28 = arith.addf %27, %26 : vector<128x128xf32>
    %cst_19 = arith.constant 1.000000e+00 : f32
    %29 = vector.broadcast %cst_19 : f32 to vector<128x128xf32>
    %30 = arith.divf %29, %28 : vector<128x128xf32>
    %c0_20 = arith.constant 0 : index
    %c0_21 = arith.constant 0 : index
    %31 = vector.load %arg8[%c0_20, %c0_21] : memref<128x128xf32, #tpu.memory_space<vmem>>, vector<128x128xf32>
    tpu.vector_store %arg8[%c0_20, %c0_21], %30 {strides = array<i32>} : memref<128x128xf32, #tpu.memory_space<vmem>>, vector<128x128xf32>,
    return
  }
  func.func @transform_0(%arg0: i32) -> (i32, i32) {
    %c0_i32 = arith.constant 0 : i32
    %c0_i32_0 = arith.constant 0 : i32
    return %arg0, %c0_i32 : i32, i32
  }
  func.func @transform_1(%arg0: i32) -> (i32, i32) {
    %c0_i32 = arith.constant 0 : i32
    %c0_i32_0 = arith.constant 0 : i32
    %c0_i32_1 = arith.constant 0 : i32
    return %c0_i32, %c0_i32_0 : i32, i32
  }
  func.func @transform_2(%arg0: i32) -> (i32, i32) {
    %c0_i32 = arith.constant 0 : i32
    %c0_i32_0 = arith.constant 0 : i32
    %c0_i32_1 = arith.constant 0 : i32
    return %c0_i32, %c0_i32_0 : i32, i32
  }
  func.func @transform_3(%arg0: i32) -> (i32, i32) {
    %c0_i32 = arith.constant 0 : i32
    %c0_i32_0 = arith.constant 0 : i32
    %c0_i32_1 = arith.constant 0 : i32
    return %c0_i32, %c0_i32_0 : i32, i32
  }
  func.func @transform_4(%arg0: i32) -> (i32, i32) {
    %c0_i32 = arith.constant 0 : i32
    %c0_i32_0 = arith.constant 0 : i32
    %c0_i32_1 = arith.constant 0 : i32
    return %c0_i32, %c0_i32_0 : i32, i32
  }
  func.func @transform_5(%arg0: i32) -> (i32, i32) {
    %c0_i32 = arith.constant 0 : i32
    %c0_i32_0 = arith.constant 0 : i32
    %c0_i32_1 = arith.constant 0 : i32
    return %c0_i32, %c0_i32_0 : i32, i32
  }
  func.func @transform_6(%arg0: i32) -> (i32, i32) {
    %c0_i32 = arith.constant 0 : i32
    %c0_i32_0 = arith.constant 0 : i32
    %c0_i32_1 = arith.constant 0 : i32
    return %c0_i32, %c0_i32_0 : i32, i32
  }
  func.func @transform_7(%arg0: i32) -> (i32, i32) {
    %c0_i32 = arith.constant 0 : i32
    %c0_i32_0 = arith.constant 0 : i32
    return %arg0, %c0_i32 : i32, i32
  }
}

</mosaic_0001>

<bundles_post_ra>
// kernel: tpu_custom_call.1
= control target key start
LH: loop header
LB: loop body
LE: loop exit
PB: predicated region body
PF: predicated region fallthrough
CT: control target
= control target key end

     0   :  { %12 = vsyncpa [#allocation3], 0  ;;  %s1496_s0 = inlined_call_operand.hbm [shape: bf16[128,128], index: 0, kind: input, shape index: {}]   ;;  %s1497_s1 = inlined_call_operand.hbm [shape: bf16[128,128], index: 1, kind: input, shape index: {}]   ;;  %s1498_s2 = inlined_call_operand.vmem [shape: f32[1,128], index: 2, kind: input, shape index: {}]   ;;  %s1499_s3 = inlined_call_operand.hbm [shape: bf16[128,128], index: 3, kind: input, shape index: {}]   ;;  %s1500_s4 = inlined_call_operand.vmem [shape: f32[1,128], index: 4, kind: input, shape index: {}]   ;;  %s1501_s5 = inlined_call_operand.hbm [shape: bf16[128,128], index: 5, kind: input, shape index: {}]   ;;  %s1502_s6 = inlined_call_operand.vmem [shape: f32[1,128], index: 6, kind: input, shape index: {}]   ;;  %s1503_s7 = inlined_call_operand.hbm [shape: f32[128,128], index: 7, kind: output, shape index: {}]  }
   0x1   :  { %13 = vsyncpa [#allocation6], 0 }
   0x2   :  { %14 = vsyncpa [#allocation9], 0 }
   0x3   :  { %15 = vsyncpa [#allocation4], 0  ;;  %s1280_s24 = smov [#allocation5]   ;;  %s1281_s26 = smov [#allocation2]  }
   0x4   :  { %s33_s25 = sshll.u32 %s1280_s24, 4  ;;  %s21_s27 = sshll.u32 %s1281_s26, 4  ;;  %s34_s25 = int_to_ptr.vmem [resolvable:$true] %s33_s25  ;;  %s1329_s27 = int_to_ptr.vmem [resolvable:$true] %s21_s27 }
   0x5   :  { %s1162_s30 = scalar_lea.hbm %s1497_s1, 1024 }
   0x6   :  { %p1163_p0 = scmp.ne.s32.totalorder %s1497_s1, %s1162_s30  ;;  %p1166_p1 = scmp.lt.u32.totalorder %s1162_s30, %s1497_s1 }
   0x8   :  { %p1168_p2 = pnand %p1166_p1, %p1163_p0 }
   0xa   :  { %1171 = shalt.err (!%p1168_p2)
}
   0xb   :  { %s1172_s12 = scalar_lea.vmem %s34_s25, 1024  ;;  %p1177_p4 = scmp.lt.s32.totalorder %s34_s25, %s34_s25 }
   0xc   :  { %p1173_p3 = scmp.ne.s32.totalorder %s34_s25, %s1172_s12  ;;  %p1178_p5 = scmp.lt.s32.totalorder %s1172_s12, %s1172_s12 }
   0xe   :  { %p1179_p6 = por %p1178_p5, %p1177_p4 }
  0x10   :  { %p1180_p7 = pnand %p1179_p6, %p1173_p3 }
  0x12   :  { %1183 = shalt.err (!%p1180_p7)
}
  0x13   :  { %s1282_s13 = smov 64   ;;  %s1283_s14 = smov 4  }
  0x14   :  { %39 = dma.hbm_to_vmem [thread:$0]  %s1497_s1, 1024, %s34_s25, [#allocation6], %s1282_s13, %s1282_s13, %s1283_s14  }
  0x15   :  { %s1184_s19 = scalar_lea.hbm %s1496_s0, 1024 }
  0x16   :  { %p1185_p8 = scmp.ne.s32.totalorder %s1496_s0, %s1184_s19  ;;  %p1188_p9 = scmp.lt.u32.totalorder %s1184_s19, %s1496_s0 }
  0x18   :  { %p1190_p10 = pnand %p1188_p9, %p1185_p8 }
  0x1a   :  { %1193 = shalt.err (!%p1190_p10)
}
  0x1b   :  { %s1194_s24 = scalar_lea.vmem %s1329_s27, 1024  ;;  %p1199_p12 = scmp.lt.s32.totalorder %s1329_s27, %s1329_s27 }
  0x1c   :  { %p1195_p11 = scmp.ne.s32.totalorder %s1329_s27, %s1194_s24  ;;  %p1200_p13 = scmp.lt.s32.totalorder %s1194_s24, %s1194_s24 }
  0x1e   :  { %p1201_p0 = por %p1200_p13, %p1199_p12 }
  0x20   :  { %p1202_p1 = pnand %p1201_p0, %p1195_p11 }
  0x22   :  { %1205 = shalt.err (!%p1202_p1)
}
  0x23   :  { %27 = dma.hbm_to_vmem [thread:$0]  %s1496_s0, 1024, %s1329_s27, [#allocation3], %s1282_s13, %s1282_s13, %s1283_s14  }
  0x24   :  { %s1284_s26 = smov [#allocation7]   ;;  %s1285_s29 = smov [#allocation8]  }
  0x25   :  { %s47_s28 = sshll.u32 %s1284_s26, 4  ;;  %s61_s30 = sshll.u32 %s1285_s29, 4  ;;  %s48_s28 = int_to_ptr.vmem [resolvable:$true] %s47_s28  ;;  %s1366_s30 = int_to_ptr.vmem [resolvable:$true] %s61_s30 }
  0x26   :  { %s1206_s10 = scalar_lea.hbm %s1499_s3, 1024 }
  0x27   :  { %p1207_p2 = scmp.ne.s32.totalorder %s1499_s3, %s1206_s10  ;;  %p1210_p3 = scmp.lt.u32.totalorder %s1206_s10, %s1499_s3 }
  0x29   :  { %p1212_p4 = pnand %p1210_p3, %p1207_p2 }
  0x2b   :  { %1215 = shalt.err (!%p1212_p4)
}
  0x2c   :  { %s1216_s0 = scalar_lea.vmem %s48_s28, 1024  ;;  %p1221_p6 = scmp.lt.s32.totalorder %s48_s28, %s48_s28 }
  0x2d   :  { %p1217_p5 = scmp.ne.s32.totalorder %s48_s28, %s1216_s0  ;;  %p1222_p7 = scmp.lt.s32.totalorder %s1216_s0, %s1216_s0 }
  0x2f   :  { %p1223_p8 = por %p1222_p7, %p1221_p6 }
  0x31   :  { %p1224_p9 = pnand %p1223_p8, %p1217_p5 }
  0x33   :  { %1227 = shalt.err (!%p1224_p9)
}
  0x34   :  { %53 = dma.hbm_to_vmem [thread:$0]  %s1499_s3, 1024, %s48_s28, [#allocation6], %s1282_s13, %s1282_s13, %s1283_s14  }
  0x35   :  { %s1228_s20 = scalar_lea.hbm %s1501_s5, 1024 }
  0x36   :  { %p1229_p10 = scmp.ne.s32.totalorder %s1501_s5, %s1228_s20  ;;  %p1232_p11 = scmp.lt.u32.totalorder %s1228_s20, %s1501_s5 }
  0x38   :  { %p1234_p12 = pnand %p1232_p11, %p1229_p10 }
  0x3a   :  { %1237 = shalt.err (!%p1234_p12)
}
  0x3b   :  { %s1238_s1 = scalar_lea.vmem %s1366_s30, 1024  ;;  %p1243_p0 = scmp.lt.s32.totalorder %s1366_s30, %s1366_s30 }
  0x3c   :  { %p1239_p13 = scmp.ne.s32.totalorder %s1366_s30, %s1238_s1  ;;  %p1244_p1 = scmp.lt.s32.totalorder %s1238_s1, %s1238_s1 }
  0x3e   :  { %p1245_p2 = por %p1244_p1, %p1243_p0 }
  0x40   :  { %p1246_p3 = pnand %p1245_p2, %p1239_p13 }
  0x42   :  { %1249 = shalt.err (!%p1246_p3)
}
  0x43   :  { %67 = dma.hbm_to_vmem [thread:$0]  %s1501_s5, 1024, %s1366_s30, [#allocation9], %s1282_s13, %s1282_s13, %s1283_s14  }
  0x44   :  { %1272 = dma.done.wait [#allocation3], 1024  }
  0x45   :  { %1273 = vsyncadd [#allocation3], 4294966272 }
  0x46   :  { %1274 = dma.done.wait [#allocation6], 2048  }
  0x47   :  { %1275 = vsyncadd [#allocation6], 4294965248 }
  0x48   :  { %1276 = dma.done.wait [#allocation9], 1024  }
  0x49   :  { %1277 = vsyncadd [#allocation9], 4294966272  ;;  %v1066_v0 = vld [vmem:[#allocation5] sm:$0xff]   ;;  %v1067_v1 = vld [vmem:[#allocation5 + $0x8] sm:$0xff]  }
  0x4a   :  { %945 = vmatprep.subr.bf16.mxu0 %v1066_v0  ;;  %v1068_v2 = vld [vmem:[#allocation5 + $0x10] sm:$0xff]   ;;  %v1069_v3 = vld [vmem:[#allocation5 + $0x18] sm:$0xff]   ;;  %v1074_v4 = vld [vmem:[#allocation2] sm:$0xff]  }
  0x4b   :  { %946 = vmatpush3.bf16.msra.mxu0 %v1066_v0  ;;  %961 = vmatprep.mubr.bf16.mxu0 %v1074_v4  ;;  %v1070_v5 = vld [vmem:[#allocation5 + $0x20] sm:$0xff]   ;;  %v1071_v6 = vld [vmem:[#allocation5 + $0x28] sm:$0xff]   ;;  %v1072_v9 = vld [vmem:[#allocation5 + $0x30] sm:$0xff]  }
  0x4c   :  { %947 = vmatprep.subr.bf16.mxu0 %v1067_v1  ;;  %v1082_v7 = vld [vmem:[#allocation7] sm:$0xff]   ;;  %v1083_v8 = vld [vmem:[#allocation7 + $0x8] sm:$0xff]   ;;  %v1084_v10 = vld [vmem:[#allocation7 + $0x10] sm:$0xff]  }
  0x4d   :  { %977 = vmatprep.subr.bf16.mxu1 %v1082_v7  ;;  %v1073_v11 = vld [vmem:[#allocation5 + $0x38] sm:$0xff]   ;;  %v1086_v13 = vld [vmem:[#allocation7 + $0x20] sm:$0xff]   ;;  %v1075_v14 = vld [vmem:[#allocation2 + $0x8] sm:$0xff]  }
  0x4e   :  { %978 = vmatpush3.bf16.msra.mxu1 %v1082_v7  ;;  %v1085_v12 = vld [vmem:[#allocation7 + $0x18] sm:$0xff]   ;;  %v1076_v15 = vld [vmem:[#allocation2 + $0x10] sm:$0xff]   ;;  %v1078_v17 = vld [vmem:[#allocation2 + $0x20] sm:$0xff]  }
  0x4f   :  { %948 = vmatpush3.bf16.msra.mxu0 %v1067_v1  ;;  %979 = vmatprep.subr.bf16.mxu1 %v1083_v8  ;;  %v1077_v16 = vld [vmem:[#allocation2 + $0x18] sm:$0xff]   ;;  %v1079_v18 = vld [vmem:[#allocation2 + $0x28] sm:$0xff]   ;;  %v1080_v19 = vld [vmem:[#allocation2 + $0x30] sm:$0xff]  }
  0x50   :  { %949 = vmatprep.subr.bf16.mxu0 %v1068_v2  ;;  %v1081_v20 = vld [vmem:[#allocation2 + $0x38] sm:$0xff]   ;;  %v1087_v21 = vld [vmem:[#allocation7 + $0x28] sm:$0xff]   ;;  %v1088_v22 = vld [vmem:[#allocation7 + $0x30] sm:$0xff]  }
  0x51   :  { %v1089_v23 = vld [vmem:[#allocation7 + $0x38] sm:$0xff]   ;;  %v1090_v24 = vld [vmem:[#allocation8] sm:$0xff]   ;;  %v1091_v25 = vld [vmem:[#allocation8 + $0x8] sm:$0xff]  }
  0x52   :  { %980 = vmatpush3.bf16.msra.mxu1 %v1083_v8  ;;  %v1403_v26 = vld [vmem:[#allocation8 + $0x10] sm:$0xff]   ;;  %v1406_v27 = vld [vmem:[#allocation8 + $0x18] sm:$0xff]   ;;  %v1410_v28 = vld [vmem:[#allocation8 + $0x20] sm:$0xff]  }
  0x53   :  { %950 = vmatpush3.bf16.msra.mxu0 %v1068_v2  ;;  %981 = vmatprep.subr.bf16.mxu1 %v1084_v10  ;;  %v1418_v29 = vld [vmem:[%s1498_s2] ss:$0 sm:$0xff] }
  0x54   :  { %951 = vmatprep.subr.bf16.mxu0 %v1069_v3 }
  0x56   :  { %982 = vmatpush3.bf16.msra.mxu1 %v1084_v10 }
  0x57   :  { %952 = vmatpush3.bf16.msra.mxu0 %v1069_v3  ;;  %983 = vmatprep.subr.bf16.mxu1 %v1085_v12 }
  0x58   :  { %953 = vmatprep.subr.bf16.mxu0 %v1070_v5 }
  0x5a   :  { %984 = vmatpush3.bf16.msra.mxu1 %v1085_v12 }
  0x5b   :  { %954 = vmatpush3.bf16.msra.mxu0 %v1070_v5  ;;  %985 = vmatprep.subr.bf16.mxu1 %v1086_v13 }
  0x5c   :  { %955 = vmatprep.subr.bf16.mxu0 %v1071_v6 }
  0x5e   :  { %986 = vmatpush3.bf16.msra.mxu1 %v1086_v13 }
  0x5f   :  { %956 = vmatpush3.bf16.msra.mxu0 %v1071_v6  ;;  %987 = vmatprep.subr.bf16.mxu1 %v1087_v21 }
  0x60   :  { %957 = vmatprep.subr.bf16.mxu0 %v1072_v9 }
  0x62   :  { %988 = vmatpush3.bf16.msra.mxu1 %v1087_v21 }
  0x63   :  { %958 = vmatpush3.bf16.msra.mxu0 %v1072_v9  ;;  %989 = vmatprep.subr.bf16.mxu1 %v1088_v22 }
  0x64   :  { %959 = vmatprep.subr.bf16.mxu0 %v1073_v11 }
  0x66   :  { %990 = vmatpush3.bf16.msra.mxu1 %v1088_v22 }
  0x67   :  { %960 = vmatpush3.bf16.msra.mxu0 %v1073_v11  ;;  %991 = vmatprep.subr.bf16.mxu1 %v1089_v23 }
  0x68   :  { %1009 = vmatprep.subr.bf16.mxu0 %v1090_v24 }
  0x6a   :  { %962 = vmatmul.mubr.bf16.vlgmr.msra.gmra.mrb[0].mxu0 %v1075_v14  ;;  %992 = vmatpush3.bf16.msra.mxu1 %v1089_v23 }
  0x6b   :  { %965 = vmatprep.mubr.bf16.mxu0 %v1076_v15  ;;  %1041 = vmatprep.subr.bf16.mxu1 %v1090_v24 }
  0x6c   :  { %1010 = vmatpush3.bf16.msra.mxu0 %v1090_v24 }
  0x6d   :  { %1011 = vmatprep.subr.bf16.mxu0 %v1091_v25 }
  0x70   :  { %1012 = vmatpush3.bf16.msra.mxu0 %v1091_v25 }
  0x71   :  { %1013 = vmatprep.subr.bf16.mxu0 %v1403_v26 }
  0x72   :  { %966 = vmatmul.mubr.bf16.gmra.mrb[4].mxu0 %v1077_v16 }
  0x73   :  { %969 = vmatprep.mubr.bf16.mxu0 %v1078_v17 }
  0x74   :  { %1014 = vmatpush3.bf16.msra.mxu0 %v1403_v26 }
  0x75   :  { %1015 = vmatprep.subr.bf16.mxu0 %v1406_v27 }
  0x78   :  { %1016 = vmatpush3.bf16.msra.mxu0 %v1406_v27 }
  0x79   :  { %1017 = vmatprep.subr.bf16.mxu0 %v1410_v28 }
  0x7a   :  { %970 = vmatmul.mubr.bf16.gmra.mrb[8].mxu0 %v1079_v18 }
  0x7b   :  { %973 = vmatprep.mubr.bf16.mxu0 %v1080_v19 }
  0x7c   :  { %1018 = vmatpush3.bf16.msra.mxu0 %v1410_v28 }
  0x82   :  { %974 = vmatmul.mubr.bf16.gmra.mrb[12].mxu0 %v1081_v20 }
 0x13d   :  { %v963_v30 = vpop.f32.mrb[0].mxu0 }
 0x13e   :  { %v261_v31 = vadd.f32 %v963_v30, %v1418_v29  ;;  %v252_v32 = vpop.f32.mrb[1].mxu0 }
 0x13f   :  { %v253_v33 = vadd.f32 %v1418_v29, %v252_v32  ;;  %v964_v34 = vpop.f32.mrb[2].mxu0 }
 0x140   :  { %v317_v35 = vmul.f32 0.2, %v261_v31  ;;  %v264_v36 = vadd.f32 %v964_v34, %v1418_v29  ;;  %v255_v37 = vpop.f32.mrb[3].mxu0 }
 0x141   :  { %v315_v38 = vmul.f32 0.2, %v253_v33  ;;  %v256_v39 = vadd.f32 %v1418_v29, %v255_v37 }
 0x142   :  { %v318_v40 = vmul.f32 0.2, %v264_v36  ;;  %v333_v42 = vmax.f32 %v261_v31, %v317_v35 }
 0x143   :  { %v316_v41 = vmul.f32 0.2, %v256_v39  ;;  %v331_v45 = vmax.f32 %v253_v33, %v315_v38 }
 0x144   :  { %v334_v43 = vmax.f32 %v264_v36, %v318_v40  ;;  %v1095_v40 = vld [vmem:[#allocation8 + $0x28] sm:$0xff]  }
 0x145   :  { %v967_v44 = vpop.f32.mrb[4].mxu0  ;;  %v332_v46 = vmax.f32 %v256_v39, %v316_v41  ;;  %1019 = vmatprep.subr.bf16.mxu0 %v1095_v40  ;;  %v1097_v41 = vld [vmem:[#allocation8 + $0x38] sm:$0xff]  }
 0x146   :  { %v277_v47 = vadd.f32 %v967_v44, %v1418_v29  ;;  %v268_v48 = vpop.f32.mrb[5].mxu0  ;;  %v348_v49 = vpack.c.bf16 %v334_v43, %v333_v42  ;;  %1020 = vmatpush3.bf16.msra.mxu0 %v1095_v40 }
 0x147   :  { %v269_v50 = vadd.f32 %v1418_v29, %v268_v48  ;;  %v968_v51 = vpop.f32.mrb[6].mxu0  ;;  %v347_v52 = vpack.c.bf16 %v332_v46, %v331_v45 }
 0x148   :  { %v321_v53 = vmul.f32 0.2, %v277_v47  ;;  %v280_v54 = vadd.f32 %v968_v51, %v1418_v29  ;;  %v271_v55 = vpop.f32.mrb[7].mxu0 }
 0x149   :  { %v319_v56 = vmul.f32 0.2, %v269_v50  ;;  %v272_v57 = vadd.f32 %v1418_v29, %v271_v55  ;;  %993 = vmatprep.mubr.bf16.mxu1 %v347_v52 }
 0x14a   :  { %v322_v58 = vmul.f32 0.2, %v280_v54  ;;  %994 = vmatmul.mubr.bf16.vlgmr.msra.gmra.mrb[0].mxu1 %v348_v49  ;;  %v337_v60 = vmax.f32 %v277_v47, %v321_v53 }
 0x14b   :  { %v320_v59 = vmul.f32 0.2, %v272_v57  ;;  %1049 = vmatpush3.bf16.msra.mxu1 %v1090_v24  ;;  %v335_v62 = vmax.f32 %v269_v50, %v319_v56 }
 0x14c   :  { %v338_v61 = vmax.f32 %v280_v54, %v322_v58  ;;  %1042 = vmatprep.subr.bf16.mxu1 %v1091_v25 }
 0x14d   :  { %v336_v63 = vmax.f32 %v272_v57, %v320_v59  ;;  %v971_v0 = vpop.f32.mrb[8].mxu0 }
 0x14e   :  { %v293_v1 = vadd.f32 %v971_v0, %v1418_v29  ;;  %v284_v2 = vpop.f32.mrb[9].mxu0  ;;  %v350_v3 = vpack.c.bf16 %v338_v61, %v337_v60 }
 0x14f   :  { %v285_v4 = vadd.f32 %v1418_v29, %v284_v2  ;;  %v972_v5 = vpop.f32.mrb[10].mxu0  ;;  %v349_v6 = vpack.c.bf16 %v336_v63, %v335_v62  ;;  %1050 = vmatpush3.bf16.msra.mxu1 %v1091_v25 }
 0x150   :  { %v325_v7 = vmul.f32 0.2, %v293_v1  ;;  %v296_v8 = vadd.f32 %v972_v5, %v1418_v29  ;;  %v287_v9 = vpop.f32.mrb[11].mxu0  ;;  %1043 = vmatprep.subr.bf16.mxu1 %v1403_v26 }
 0x151   :  { %v323_v10 = vmul.f32 0.2, %v285_v4  ;;  %v288_v11 = vadd.f32 %v1418_v29, %v287_v9  ;;  %997 = vmatprep.mubr.bf16.mxu1 %v349_v6 }
 0x152   :  { %v326_v12 = vmul.f32 0.2, %v296_v8  ;;  %998 = vmatmul.mubr.bf16.gmra.mrb[4].mxu1 %v350_v3  ;;  %v341_v14 = vmax.f32 %v293_v1, %v325_v7 }
 0x153   :  { %v324_v13 = vmul.f32 0.2, %v288_v11  ;;  %1051 = vmatpush3.bf16.msra.mxu1 %v1403_v26  ;;  %v339_v16 = vmax.f32 %v285_v4, %v323_v10 }
 0x154   :  { %v342_v15 = vmax.f32 %v296_v8, %v326_v12  ;;  %1044 = vmatprep.subr.bf16.mxu1 %v1406_v27 }
 0x155   :  { %v340_v17 = vmax.f32 %v288_v11, %v324_v13  ;;  %v975_v18 = vpop.f32.mrb[12].mxu0 }
 0x156   :  { %v309_v19 = vadd.f32 %v975_v18, %v1418_v29  ;;  %v300_v20 = vpop.f32.mrb[13].mxu0  ;;  %v352_v21 = vpack.c.bf16 %v342_v15, %v341_v14 }
 0x157   :  { %v301_v22 = vadd.f32 %v1418_v29, %v300_v20  ;;  %v976_v23 = vpop.f32.mrb[14].mxu0  ;;  %v351_v24 = vpack.c.bf16 %v340_v17, %v339_v16  ;;  %1052 = vmatpush3.bf16.msra.mxu1 %v1406_v27 }
 0x158   :  { %v329_v25 = vmul.f32 0.2, %v309_v19  ;;  %v312_v26 = vadd.f32 %v976_v23, %v1418_v29  ;;  %v303_v30 = vpop.f32.mrb[15].mxu0  ;;  %1045 = vmatprep.subr.bf16.mxu1 %v1410_v28 }
 0x159   :  { %v327_v31 = vmul.f32 0.2, %v301_v22  ;;  %v304_v32 = vadd.f32 %v1418_v29, %v303_v30  ;;  %1001 = vmatprep.mubr.bf16.mxu1 %v351_v24  ;;  %v1096_v29 = vld [vmem:[#allocation8 + $0x30] sm:$0xff]  }
 0x15a   :  { %v330_v33 = vmul.f32 0.2, %v312_v26  ;;  %1002 = vmatmul.mubr.bf16.gmra.mrb[8].mxu1 %v352_v21  ;;  %v345_v35 = vmax.f32 %v309_v19, %v329_v25  ;;  %1021 = vmatprep.subr.bf16.mxu0 %v1096_v29 }
 0x15b   :  { %v328_v34 = vmul.f32 0.2, %v304_v32  ;;  %1053 = vmatpush3.bf16.msra.mxu1 %v1410_v28  ;;  %v343_v37 = vmax.f32 %v301_v22, %v327_v31  ;;  %1022 = vmatpush3.bf16.msra.mxu0 %v1096_v29  ;;  %v1445_v28 = vld [vmem:[%s1500_s4] ss:$0 sm:$0xff] }
 0x15c   :  { %v346_v36 = vmax.f32 %v312_v26, %v330_v33  ;;  %1046 = vmatprep.subr.bf16.mxu1 %v1095_v40  ;;  %1023 = vmatprep.subr.bf16.mxu0 %v1097_v41 }
 0x15d   :  { %v344_v38 = vmax.f32 %v304_v32, %v328_v34 }
 0x15e   :  { %v354_v27 = vpack.c.bf16 %v346_v36, %v345_v35 }
 0x15f   :  { %v353_v39 = vpack.c.bf16 %v344_v38, %v343_v37  ;;  %1054 = vmatpush3.bf16.msra.mxu1 %v1095_v40  ;;  %1024 = vmatpush3.bf16.msra.mxu0 %v1097_v41 }
 0x160   :  { %1047 = vmatprep.subr.bf16.mxu1 %v1096_v29 }
 0x161   :  { %1005 = vmatprep.mubr.bf16.mxu1 %v353_v39 }
 0x162   :  { %1006 = vmatmul.mubr.bf16.gmra.mrb[12].mxu1 %v354_v27 }
 0x163   :  { %1055 = vmatpush3.bf16.msra.mxu1 %v1096_v29 }
 0x164   :  { %1048 = vmatprep.subr.bf16.mxu1 %v1097_v41 }
 0x167   :  { %1056 = vmatpush3.bf16.msra.mxu1 %v1097_v41 }
 0x21d   :  { %v995_v42 = vpop.f32.mrb[0].mxu1 }
 0x21e   :  { %v469_v43 = vadd.f32 %v995_v42, %v1445_v28  ;;  %v460_v44 = vpop.f32.mrb[1].mxu1 }
 0x21f   :  { %v461_v45 = vadd.f32 %v1445_v28, %v460_v44  ;;  %v996_v46 = vpop.f32.mrb[2].mxu1 }
 0x220   :  { %v525_v47 = vmul.f32 0.2, %v469_v43  ;;  %v472_v48 = vadd.f32 %v996_v46, %v1445_v28  ;;  %v463_v49 = vpop.f32.mrb[3].mxu1 }
 0x221   :  { %v523_v50 = vmul.f32 0.2, %v461_v45  ;;  %v464_v51 = vadd.f32 %v1445_v28, %v463_v49 }
 0x222   :  { %v526_v52 = vmul.f32 0.2, %v472_v48  ;;  %v541_v54 = vmax.f32 %v469_v43, %v525_v47 }
 0x223   :  { %v524_v53 = vmul.f32 0.2, %v464_v51  ;;  %v539_v56 = vmax.f32 %v461_v45, %v523_v50 }
 0x224   :  { %v542_v55 = vmax.f32 %v472_v48, %v526_v52 }
 0x225   :  { %v540_v57 = vmax.f32 %v464_v51, %v524_v53  ;;  %v999_v58 = vpop.f32.mrb[4].mxu1  ;;  %v1466_v51 = vld [vmem:[%s1502_s6] ss:$0 sm:$0xff]  ;;  %s1286_s6 = smov [#allocation10]  }
 0x226   :  { %v556_v59 = vpack.c.bf16 %v542_v55, %v541_v54  ;;  %v485_v60 = vadd.f32 %v999_v58, %v1445_v28  ;;  %v476_v61 = vpop.f32.mrb[5].mxu1  ;;  %s848_s28 = sshll.u32 %s1286_s6, 4  ;;  %s849_s28 = int_to_ptr.vmem [resolvable:$true] %s848_s28 }
 0x227   :  { %v477_v62 = vadd.f32 %v1445_v28, %v476_v61  ;;  %v1000_v63 = vpop.f32.mrb[6].mxu1  ;;  %v555_v0 = vpack.c.bf16 %v540_v57, %v539_v56  ;;  %s1250_s29 = scalar_lea.vmem %s849_s28, 2048  ;;  %p1255_p5 = scmp.lt.s32.totalorder %s849_s28, %s849_s28 }
 0x228   :  { %v529_v1 = vmul.f32 0.2, %v485_v60  ;;  %v488_v2 = vadd.f32 %v1000_v63, %v1445_v28  ;;  %v479_v3 = vpop.f32.mrb[7].mxu1  ;;  %p1251_p4 = scmp.ne.s32.totalorder %s849_s28, %s1250_s29  ;;  %p1256_p6 = scmp.lt.s32.totalorder %s1250_s29, %s1250_s29 }
 0x229   :  { %v527_v4 = vmul.f32 0.2, %v477_v62  ;;  %v480_v5 = vadd.f32 %v1445_v28, %v479_v3  ;;  %1025 = vmatprep.mubr.bf16.mxu0 %v555_v0 }
 0x22a   :  { %v530_v6 = vmul.f32 0.2, %v488_v2  ;;  %1026 = vmatmul.mubr.bf16.vlgmr.msra.gmra.mrb[16].mxu0 %v556_v59  ;;  %v545_v8 = vmax.f32 %v485_v60, %v529_v1  ;;  %p1257_p7 = por %p1256_p6, %p1255_p5 }
 0x22b   :  { %v528_v7 = vmul.f32 0.2, %v480_v5  ;;  %v543_v10 = vmax.f32 %v477_v62, %v527_v4 }
 0x22c   :  { %v546_v9 = vmax.f32 %v488_v2, %v530_v6  ;;  %p1258_p8 = pnand %p1257_p7, %p1251_p4 }
 0x22d   :  { %v544_v11 = vmax.f32 %v480_v5, %v528_v7  ;;  %v1003_v12 = vpop.f32.mrb[8].mxu1 }
 0x22e   :  { %v501_v13 = vadd.f32 %v1003_v12, %v1445_v28  ;;  %v492_v14 = vpop.f32.mrb[9].mxu1  ;;  %v558_v15 = vpack.c.bf16 %v546_v9, %v545_v8 }
 0x22f   :  { %v493_v16 = vadd.f32 %v1445_v28, %v492_v14  ;;  %v1004_v17 = vpop.f32.mrb[10].mxu1  ;;  %v557_v18 = vpack.c.bf16 %v544_v11, %v543_v10 }
 0x230   :  { %v533_v19 = vmul.f32 0.2, %v501_v13  ;;  %v504_v20 = vadd.f32 %v1004_v17, %v1445_v28  ;;  %v495_v21 = vpop.f32.mrb[11].mxu1 }
 0x231   :  { %v531_v22 = vmul.f32 0.2, %v493_v16  ;;  %v496_v23 = vadd.f32 %v1445_v28, %v495_v21  ;;  %1029 = vmatprep.mubr.bf16.mxu0 %v557_v18 }
 0x232   :  { %v534_v24 = vmul.f32 0.2, %v504_v20  ;;  %1030 = vmatmul.mubr.bf16.gmra.mrb[20].mxu0 %v558_v15  ;;  %v549_v26 = vmax.f32 %v501_v13, %v533_v19 }
 0x233   :  { %v532_v25 = vmul.f32 0.2, %v496_v23  ;;  %v547_v31 = vmax.f32 %v493_v16, %v531_v22 }
 0x234   :  { %v550_v30 = vmax.f32 %v504_v20, %v534_v24 }
 0x235   :  { %v548_v32 = vmax.f32 %v496_v23, %v532_v25  ;;  %v1007_v33 = vpop.f32.mrb[12].mxu1 }
 0x236   :  { %v560_v34 = vpack.c.bf16 %v550_v30, %v549_v26  ;;  %v517_v35 = vadd.f32 %v1007_v33, %v1445_v28  ;;  %v508_v36 = vpop.f32.mrb[13].mxu1 }
 0x237   :  { %v509_v37 = vadd.f32 %v1445_v28, %v508_v36  ;;  %v1008_v38 = vpop.f32.mrb[14].mxu1  ;;  %v559_v27 = vpack.c.bf16 %v548_v32, %v547_v31 }
 0x238   :  { %v537_v39 = vmul.f32 0.2, %v517_v35  ;;  %v520_v40 = vadd.f32 %v1008_v38, %v1445_v28  ;;  %v511_v29 = vpop.f32.mrb[15].mxu1 }
 0x239   :  { %v535_v41 = vmul.f32 0.2, %v509_v37  ;;  %v512_v42 = vadd.f32 %v1445_v28, %v511_v29  ;;  %1033 = vmatprep.mubr.bf16.mxu1 %v559_v27 }
 0x23a   :  { %v538_v43 = vmul.f32 0.2, %v520_v40  ;;  %1034 = vmatmul.mubr.bf16.vlgmr.msra.gmra.mrb[16].mxu1 %v560_v34  ;;  %v553_v45 = vmax.f32 %v517_v35, %v537_v39 }
 0x23b   :  { %v536_v44 = vmul.f32 0.2, %v512_v42  ;;  %v551_v47 = vmax.f32 %v509_v37, %v535_v41 }
 0x23c   :  { %v554_v46 = vmax.f32 %v520_v40, %v538_v43 }
 0x23d   :  { %v552_v48 = vmax.f32 %v512_v42, %v536_v44 }
 0x23e   :  { %v562_v49 = vpack.c.bf16 %v554_v46, %v553_v45 }
 0x23f   :  { %v561_v50 = vpack.c.bf16 %v552_v48, %v551_v47 }
 0x241   :  { %1037 = vmatprep.mubr.bf16.mxu1 %v561_v50 }
 0x242   :  { %1038 = vmatmul.mubr.bf16.gmra.mrb[20].mxu1 %v562_v49 }
 0x2fd   :  { %v1027_v52 = vpop.f32.mrb[16].mxu0 }
 0x2fe   :  { %v677_v28 = vadd.f32 %v1027_v52, %v1466_v51  ;;  %v668_v53 = vpop.f32.mrb[17].mxu0 }
 0x2ff   :  { %v669_v54 = vadd.f32 %v1466_v51, %v668_v53  ;;  %v1028_v55 = vpop.f32.mrb[18].mxu0 }
 0x300   :  { %v733_v56 = vsub.f32 0.0, %v677_v28  ;;  %v680_v57 = vadd.f32 %v1028_v55, %v1466_v51  ;;  %v671_v58 = vpop.f32.mrb[19].mxu0 }
 0x301   :  { %v731_v59 = vsub.f32 0.0, %v669_v54  ;;  %v672_v60 = vadd.f32 %v1466_v51, %v671_v58 }
 0x302   :  { %v751_v61 = vmul.f32 1.442695, %v733_v56  ;;  %v734_v62 = vsub.f32 0.0, %v680_v57 }
 0x303   :  { %v747_v63 = vmul.f32 1.442695, %v731_v59  ;;  %v732_v0 = vsub.f32 0.0, %v672_v60 }
 0x304   :  { %1098 = vpow2.f32 %v751_v61  ;;  %v753_v1 = vmul.f32 1.442695, %v734_v62 }
 0x305   :  { %1100 = vpow2.f32 %v747_v63  ;;  %v749_v2 = vmul.f32 1.442695, %v732_v0  ;;  %v1031_v3 = vpop.f32.mrb[20].mxu0 }
 0x306   :  { %1102 = vpow2.f32 %v753_v1  ;;  %v693_v4 = vadd.f32 %v1031_v3, %v1466_v51  ;;  %v684_v5 = vpop.f32.mrb[21].mxu0 }
 0x307   :  { %1104 = vpow2.f32 %v749_v2  ;;  %v685_v6 = vadd.f32 %v1466_v51, %v684_v5  ;;  %v1032_v7 = vpop.f32.mrb[22].mxu0 }
 0x308   :  { %v737_v8 = vsub.f32 0.0, %v693_v4  ;;  %v696_v9 = vadd.f32 %v1032_v7, %v1466_v51  ;;  %v687_v10 = vpop.f32.mrb[23].mxu0 }
 0x309   :  { %v735_v11 = vsub.f32 0.0, %v685_v6  ;;  %v688_v12 = vadd.f32 %v1466_v51, %v687_v10 }
 0x30a   :  { %v759_v13 = vmul.f32 1.442695, %v737_v8  ;;  %v738_v14 = vsub.f32 0.0, %v696_v9 }
 0x30b   :  { %v755_v15 = vmul.f32 1.442695, %v735_v11  ;;  %v736_v16 = vsub.f32 0.0, %v688_v12 }
 0x30c   :  { %1106 = vpow2.f32 %v759_v13  ;;  %v761_v17 = vmul.f32 1.442695, %v738_v14 }
 0x30d   :  { %1108 = vpow2.f32 %v755_v15  ;;  %v757_v18 = vmul.f32 1.442695, %v736_v16  ;;  %v1035_v19 = vpop.f32.mrb[16].mxu1 }
 0x30e   :  { %v1099_v20 = vpop.eup %1098  ;;  %1110 = vpow2.f32 %v761_v17  ;;  %v709_v21 = vadd.f32 %v1035_v19, %v1466_v51  ;;  %v700_v22 = vpop.f32.mrb[17].mxu1 }
 0x30f   :  { %v1101_v23 = vpop.eup %1100  ;;  %v781_v24 = vadd.f32 1.0, %v1099_v20  ;;  %1112 = vpow2.f32 %v757_v18  ;;  %v701_v25 = vadd.f32 %v1466_v51, %v700_v22  ;;  %v1036_v26 = vpop.f32.mrb[18].mxu1 }
 0x310   :  { %v1103_v30 = vpop.eup %1102  ;;  %v779_v31 = vadd.f32 1.0, %v1101_v23  ;;  %v741_v32 = vsub.f32 0.0, %v709_v21  ;;  %v712_v33 = vadd.f32 %v1036_v26, %v1466_v51  ;;  %v703_v34 = vpop.f32.mrb[19].mxu1 }
 0x311   :  { %v1105_v35 = vpop.eup %1104  ;;  %1114 = vrcp.f32 %v781_v24  ;;  %v782_v36 = vadd.f32 1.0, %v1103_v30  ;;  %v739_v37 = vsub.f32 0.0, %v701_v25  ;;  %v704_v38 = vadd.f32 %v1466_v51, %v703_v34 }
 0x312   :  { %1116 = vrcp.f32 %v779_v31  ;;  %v780_v27 = vadd.f32 1.0, %v1105_v35  ;;  %v767_v39 = vmul.f32 1.442695, %v741_v32  ;;  %v742_v40 = vsub.f32 0.0, %v712_v33 }
 0x313   :  { %1118 = vrcp.f32 %v782_v36  ;;  %v763_v29 = vmul.f32 1.442695, %v739_v37  ;;  %v740_v41 = vsub.f32 0.0, %v704_v38 }
 0x314   :  { %1120 = vrcp.f32 %v780_v27  ;;  %v769_v42 = vmul.f32 1.442695, %v742_v40 }
 0x315   :  { %1122 = vpow2.f32 %v767_v39  ;;  %v765_v43 = vmul.f32 1.442695, %v740_v41  ;;  %v1039_v44 = vpop.f32.mrb[20].mxu1 }
 0x316   :  { %v1107_v45 = vpop.eup %1106  ;;  %1124 = vpow2.f32 %v763_v29  ;;  %v725_v46 = vadd.f32 %v1039_v44, %v1466_v51  ;;  %v716_v47 = vpop.f32.mrb[21].mxu1 }
 0x317   :  { %v1109_v48 = vpop.eup %1108  ;;  %v785_v49 = vadd.f32 1.0, %v1107_v45  ;;  %1126 = vpow2.f32 %v769_v42  ;;  %v717_v50 = vadd.f32 %v1466_v51, %v716_v47  ;;  %v1040_v52 = vpop.f32.mrb[22].mxu1 }
 0x318   :  { %v1111_v28 = vpop.eup %1110  ;;  %v783_v53 = vadd.f32 1.0, %v1109_v48  ;;  %1128 = vpow2.f32 %v765_v43  ;;  %v745_v54 = vsub.f32 0.0, %v725_v46  ;;  %v728_v55 = vadd.f32 %v1040_v52, %v1466_v51  ;;  %v719_v56 = vpop.f32.mrb[23].mxu1 }
 0x319   :  { %v1113_v57 = vpop.eup %1112  ;;  %1130 = vrcp.f32 %v785_v49  ;;  %v786_v58 = vadd.f32 1.0, %v1111_v28  ;;  %v743_v59 = vsub.f32 0.0, %v717_v50  ;;  %v720_v60 = vadd.f32 %v1466_v51, %v719_v56 }
 0x31a   :  { %1132 = vrcp.f32 %v783_v53  ;;  %v784_v61 = vadd.f32 1.0, %v1113_v57  ;;  %v775_v62 = vmul.f32 1.442695, %v745_v54  ;;  %v746_v63 = vsub.f32 0.0, %v728_v55 }
 0x31b   :  { %v1115_v0 = vpop.eup %1114  ;;  %1134 = vrcp.f32 %v786_v58  ;;  %v771_v1 = vmul.f32 1.442695, %v743_v59  ;;  %v744_v2 = vsub.f32 0.0, %v720_v60 }
 0x31c   :  { %v1117_v3 = vpop.eup %1116  ;;  %829 = vst [vmem:[#allocation10 + $0x10] sm:$0xff] %v1115_v0  ;;  %1136 = vrcp.f32 %v784_v61  ;;  %v777_v4 = vmul.f32 1.442695, %v746_v63 }
 0x31d   :  { %v1119_v5 = vpop.eup %1118  ;;  %827 = vst [vmem:[#allocation10] sm:$0xff] %v1117_v3  ;;  %1138 = vpow2.f32 %v775_v62  ;;  %v773_v6 = vmul.f32 1.442695, %v744_v2 }
 0x31e   :  { %v1121_v7 = vpop.eup %1120  ;;  %830 = vst [vmem:[#allocation10 + $0x18] sm:$0xff] %v1119_v5  ;;  %1140 = vpow2.f32 %v771_v1 }
 0x31f   :  { %v1123_v51 = vpop.eup %1122  ;;  %828 = vst [vmem:[#allocation10 + $0x8] sm:$0xff] %v1121_v7  ;;  %1142 = vpow2.f32 %v777_v4 }
 0x320   :  { %v1125_v8 = vpop.eup %1124  ;;  %v789_v9 = vadd.f32 1.0, %v1123_v51  ;;  %1144 = vpow2.f32 %v773_v6 }
 0x321   :  { %v1127_v10 = vpop.eup %1126  ;;  %v787_v11 = vadd.f32 1.0, %v1125_v8 }
 0x322   :  { %v1129_v12 = vpop.eup %1128  ;;  %1146 = vrcp.f32 %v789_v9  ;;  %v790_v13 = vadd.f32 1.0, %v1127_v10 }
 0x323   :  { %v1131_v14 = vpop.eup %1130  ;;  %1148 = vrcp.f32 %v787_v11  ;;  %v788_v15 = vadd.f32 1.0, %v1129_v12 }
 0x324   :  { %v1133_v16 = vpop.eup %1132  ;;  %833 = vst [vmem:[#allocation10 + $0x30] sm:$0xff] %v1131_v14  ;;  %1150 = vrcp.f32 %v790_v13 }
 0x325   :  { %v1135_v17 = vpop.eup %1134  ;;  %831 = vst [vmem:[#allocation10 + $0x20] sm:$0xff] %v1133_v16  ;;  %1152 = vrcp.f32 %v788_v15 }
 0x326   :  { %v1137_v18 = vpop.eup %1136  ;;  %834 = vst [vmem:[#allocation10 + $0x38] sm:$0xff] %v1135_v17 }
 0x327   :  { %v1139_v19 = vpop.eup %1138  ;;  %832 = vst [vmem:[#allocation10 + $0x28] sm:$0xff] %v1137_v18 }
 0x328   :  { %v1141_v20 = vpop.eup %1140  ;;  %v793_v21 = vadd.f32 1.0, %v1139_v19 }
 0x329   :  { %v1143_v22 = vpop.eup %1142  ;;  %v791_v23 = vadd.f32 1.0, %v1141_v20 }
 0x32a   :  { %v1145_v24 = vpop.eup %1144  ;;  %1154 = vrcp.f32 %v793_v21  ;;  %v794_v25 = vadd.f32 1.0, %v1143_v22 }
 0x32b   :  { %1156 = vrcp.f32 %v791_v23  ;;  %v792_v26 = vadd.f32 1.0, %v1145_v24 }
 0x32c   :  { %v1147_v30 = vpop.eup %1146  ;;  %1158 = vrcp.f32 %v794_v25 }
 0x32d   :  { %v1149_v31 = vpop.eup %1148  ;;  %837 = vst [vmem:[#allocation10 + $0x50] sm:$0xff] %v1147_v30  ;;  %1160 = vrcp.f32 %v792_v26 }
 0x32e   :  { %v1151_v32 = vpop.eup %1150  ;;  %835 = vst [vmem:[#allocation10 + $0x40] sm:$0xff] %v1149_v31 }
 0x32f   :  { %v1153_v33 = vpop.eup %1152  ;;  %838 = vst [vmem:[#allocation10 + $0x58] sm:$0xff] %v1151_v32 }
 0x330   :  { %836 = vst [vmem:[#allocation10 + $0x48] sm:$0xff] %v1153_v33 }
 0x334   :  { %v1155_v34 = vpop.eup %1154 }
 0x335   :  { %v1157_v35 = vpop.eup %1156  ;;  %841 = vst [vmem:[#allocation10 + $0x70] sm:$0xff] %v1155_v34 }
 0x336   :  { %v1159_v36 = vpop.eup %1158  ;;  %839 = vst [vmem:[#allocation10 + $0x60] sm:$0xff] %v1157_v35 }
 0x337   :  { %v1161_v37 = vpop.eup %1160  ;;  %842 = vst [vmem:[#allocation10 + $0x78] sm:$0xff] %v1159_v36 }
 0x338   :  { %840 = vst [vmem:[#allocation10 + $0x68] sm:$0xff] %v1161_v37 }
 0x339   :  { %1261 = shalt.err (!%p1258_p8)
}
 0x33a   :  { %s1262_s9 = scalar_lea.hbm %s1503_s7, 2048 }
 0x33b   :  { %p1263_p9 = scmp.ne.s32.totalorder %s1503_s7, %s1262_s9  ;;  %p1266_p10 = scmp.lt.u32.totalorder %s1262_s9, %s1503_s7 }
 0x33d   :  { %p1268_p11 = pnand %p1266_p10, %p1263_p9 }
 0x33f   :  { %1271 = shalt.err (!%p1268_p11)
}
 0x340   :  { %s1287_s16 = smov 128   ;;  %s1288_s0 = smov 8  }
 0x341   :  { %854 = dma.vmem_to_hbm [thread:$0]  %s849_s28, 2048, %s1503_s7, [#allocation4], %s1287_s16, %s1287_s16, %s1288_s0  }
 0x342   :  { %1278 = dma.done.wait [#allocation4], 2048  }
 0x343   :  { %1279 = vsyncadd [#allocation4], 4294965248 }
 0x344   :  { %858 = vsyncpa [#allocation3], 1 }
 0x345   :  { %859 = vsyncpa [#allocation6], 1 }
 0x346   :  { %860 = vsyncpa [#allocation9], 1 }
 0x347   :  { %861 = vsyncpa [#allocation4], 1 }

// kernel: tpu_custom_call.1
= control target key start
LH: loop header
LB: loop body
LE: loop exit
PB: predicated region body
PF: predicated region fallthrough
CT: control target
= control target key end

     0   :  { %12 = vsyncpa [#allocation3], 0  ;;  %s1496_s0 = inlined_call_operand.hbm [shape: bf16[128,128], index: 0, kind: input, shape index: {}]   ;;  %s1497_s1 = inlined_call_operand.hbm [shape: bf16[128,128], index: 1, kind: input, shape index: {}]   ;;  %s1498_s2 = inlined_call_operand.vmem [shape: f32[1,128], index: 2, kind: input, shape index: {}]   ;;  %s1499_s3 = inlined_call_operand.hbm [shape: bf16[128,128], index: 3, kind: input, shape index: {}]   ;;  %s1500_s4 = inlined_call_operand.vmem [shape: f32[1,128], index: 4, kind: input, shape index: {}]   ;;  %s1501_s5 = inlined_call_operand.hbm [shape: bf16[128,128], index: 5, kind: input, shape index: {}]   ;;  %s1502_s6 = inlined_call_operand.vmem [shape: f32[1,128], index: 6, kind: input, shape index: {}]   ;;  %s1503_s7 = inlined_call_operand.hbm [shape: f32[128,128], index: 7, kind: output, shape index: {}]  }
   0x1   :  { %13 = vsyncpa [#allocation6], 0 }
   0x2   :  { %14 = vsyncpa [#allocation9], 0 }
   0x3   :  { %15 = vsyncpa [#allocation4], 0  ;;  %s1280_s24 = smov [#allocation5]   ;;  %s1281_s26 = smov [#allocation2]  }
   0x4   :  { %s33_s25 = sshll.u32 %s1280_s24, 4  ;;  %s21_s27 = sshll.u32 %s1281_s26, 4  ;;  %s34_s25 = int_to_ptr.vmem [resolvable:$true] %s33_s25  ;;  %s1329_s27 = int_to_ptr.vmem [resolvable:$true] %s21_s27 }
   0x5   :  { %s1162_s30 = scalar_lea.hbm %s1497_s1, 1024 }
   0x6   :  { %p1163_p0 = scmp.ne.s32.totalorder %s1497_s1, %s1162_s30  ;;  %p1166_p1 = scmp.lt.u32.totalorder %s1162_s30, %s1497_s1 }
   0x8   :  { %p1168_p2 = pnand %p1166_p1, %p1163_p0 }
   0xa   :  { %1171 = shalt.err (!%p1168_p2)
}
   0xb   :  { %s1172_s12 = scalar_lea.vmem %s34_s25, 1024  ;;  %p1177_p4 = scmp.lt.s32.totalorder %s34_s25, %s34_s25 }
   0xc   :  { %p1173_p3 = scmp.ne.s32.totalorder %s34_s25, %s1172_s12  ;;  %p1178_p5 = scmp.lt.s32.totalorder %s1172_s12, %s1172_s12 }
   0xe   :  { %p1179_p6 = por %p1178_p5, %p1177_p4 }
  0x10   :  { %p1180_p7 = pnand %p1179_p6, %p1173_p3 }
  0x12   :  { %1183 = shalt.err (!%p1180_p7)
}
  0x13   :  { %s1282_s13 = smov 64   ;;  %s1283_s14 = smov 4  }
  0x14   :  { %39 = dma.hbm_to_vmem [thread:$0]  %s1497_s1, 1024, %s34_s25, [#allocation6], %s1282_s13, %s1282_s13, %s1283_s14  }
  0x15   :  { %s1184_s19 = scalar_lea.hbm %s1496_s0, 1024 }
  0x16   :  { %p1185_p8 = scmp.ne.s32.totalorder %s1496_s0, %s1184_s19  ;;  %p1188_p9 = scmp.lt.u32.totalorder %s1184_s19, %s1496_s0 }
  0x18   :  { %p1190_p10 = pnand %p1188_p9, %p1185_p8 }
  0x1a   :  { %1193 = shalt.err (!%p1190_p10)
}
  0x1b   :  { %s1194_s24 = scalar_lea.vmem %s1329_s27, 1024  ;;  %p1199_p12 = scmp.lt.s32.totalorder %s1329_s27, %s1329_s27 }
  0x1c   :  { %p1195_p11 = scmp.ne.s32.totalorder %s1329_s27, %s1194_s24  ;;  %p1200_p13 = scmp.lt.s32.totalorder %s1194_s24, %s1194_s24 }
  0x1e   :  { %p1201_p0 = por %p1200_p13, %p1199_p12 }
  0x20   :  { %p1202_p1 = pnand %p1201_p0, %p1195_p11 }
  0x22   :  { %1205 = shalt.err (!%p1202_p1)
}
  0x23   :  { %27 = dma.hbm_to_vmem [thread:$0]  %s1496_s0, 1024, %s1329_s27, [#allocation3], %s1282_s13, %s1282_s13, %s1283_s14  }
  0x24   :  { %s1284_s26 = smov [#allocation7]   ;;  %s1285_s29 = smov [#allocation8]  }
  0x25   :  { %s47_s28 = sshll.u32 %s1284_s26, 4  ;;  %s61_s30 = sshll.u32 %s1285_s29, 4  ;;  %s48_s28 = int_to_ptr.vmem [resolvable:$true] %s47_s28  ;;  %s1366_s30 = int_to_ptr.vmem [resolvable:$true] %s61_s30 }
  0x26   :  { %s1206_s10 = scalar_lea.hbm %s1499_s3, 1024 }
  0x27   :  { %p1207_p2 = scmp.ne.s32.totalorder %s1499_s3, %s1206_s10  ;;  %p1210_p3 = scmp.lt.u32.totalorder %s1206_s10, %s1499_s3 }
  0x29   :  { %p1212_p4 = pnand %p1210_p3, %p1207_p2 }
  0x2b   :  { %1215 = shalt.err (!%p1212_p4)
}
  0x2c   :  { %s1216_s0 = scalar_lea.vmem %s48_s28, 1024  ;;  %p1221_p6 = scmp.lt.s32.totalorder %s48_s28, %s48_s28 }
  0x2d   :  { %p1217_p5 = scmp.ne.s32.totalorder %s48_s28, %s1216_s0  ;;  %p1222_p7 = scmp.lt.s32.totalorder %s1216_s0, %s1216_s0 }
  0x2f   :  { %p1223_p8 = por %p1222_p7, %p1221_p6 }
  0x31   :  { %p1224_p9 = pnand %p1223_p8, %p1217_p5 }
  0x33   :  { %1227 = shalt.err (!%p1224_p9)
}
  0x34   :  { %53 = dma.hbm_to_vmem [thread:$0]  %s1499_s3, 1024, %s48_s28, [#allocation6], %s1282_s13, %s1282_s13, %s1283_s14  }
  0x35   :  { %s1228_s20 = scalar_lea.hbm %s1501_s5, 1024 }
  0x36   :  { %p1229_p10 = scmp.ne.s32.totalorder %s1501_s5, %s1228_s20  ;;  %p1232_p11 = scmp.lt.u32.totalorder %s1228_s20, %s1501_s5 }
  0x38   :  { %p1234_p12 = pnand %p1232_p11, %p1229_p10 }
  0x3a   :  { %1237 = shalt.err (!%p1234_p12)
}
  0x3b   :  { %s1238_s1 = scalar_lea.vmem %s1366_s30, 1024  ;;  %p1243_p0 = scmp.lt.s32.totalorder %s1366_s30, %s1366_s30 }
  0x3c   :  { %p1239_p13 = scmp.ne.s32.totalorder %s1366_s30, %s1238_s1  ;;  %p1244_p1 = scmp.lt.s32.totalorder %s1238_s1, %s1238_s1 }
  0x3e   :  { %p1245_p2 = por %p1244_p1, %p1243_p0 }
  0x40   :  { %p1246_p3 = pnand %p1245_p2, %p1239_p13 }
  0x42   :  { %1249 = shalt.err (!%p1246_p3)
}
  0x43   :  { %67 = dma.hbm_to_vmem [thread:$0]  %s1501_s5, 1024, %s1366_s30, [#allocation9], %s1282_s13, %s1282_s13, %s1283_s14  }
  0x44   :  { %1272 = dma.done.wait [#allocation3], 1024  }
  0x45   :  { %1273 = vsyncadd [#allocation3], 4294966272 }
  0x46   :  { %1274 = dma.done.wait [#allocation6], 2048  }
  0x47   :  { %1275 = vsyncadd [#allocation6], 4294965248 }
  0x48   :  { %1276 = dma.done.wait [#allocation9], 1024  }
  0x49   :  { %1277 = vsyncadd [#allocation9], 4294966272  ;;  %v1066_v0 = vld [vmem:[#allocation5] sm:$0xff]   ;;  %v1067_v1 = vld [vmem:[#allocation5 + $0x8] sm:$0xff]  }
  0x4a   :  { %945 = vmatprep.subr.bf16.mxu0 %v1066_v0  ;;  %v1068_v2 = vld [vmem:[#allocation5 + $0x10] sm:$0xff]   ;;  %v1069_v3 = vld [vmem:[#allocation5 + $0x18] sm:$0xff]   ;;  %v1074_v4 = vld [vmem:[#allocation2] sm:$0xff]  }
  0x4b   :  { %946 = vmatpush3.bf16.msra.mxu0 %v1066_v0  ;;  %961 = vmatprep.mubr.bf16.mxu0 %v1074_v4  ;;  %v1070_v5 = vld [vmem:[#allocation5 + $0x20] sm:$0xff]   ;;  %v1071_v6 = vld [vmem:[#allocation5 + $0x28] sm:$0xff]   ;;  %v1072_v9 = vld [vmem:[#allocation5 + $0x30] sm:$0xff]  }
  0x4c   :  { %947 = vmatprep.subr.bf16.mxu0 %v1067_v1  ;;  %v1082_v7 = vld [vmem:[#allocation7] sm:$0xff]   ;;  %v1083_v8 = vld [vmem:[#allocation7 + $0x8] sm:$0xff]   ;;  %v1084_v10 = vld [vmem:[#allocation7 + $0x10] sm:$0xff]  }
  0x4d   :  { %977 = vmatprep.subr.bf16.mxu1 %v1082_v7  ;;  %v1073_v11 = vld [vmem:[#allocation5 + $0x38] sm:$0xff]   ;;  %v1086_v13 = vld [vmem:[#allocation7 + $0x20] sm:$0xff]   ;;  %v1075_v14 = vld [vmem:[#allocation2 + $0x8] sm:$0xff]  }
  0x4e   :  { %978 = vmatpush3.bf16.msra.mxu1 %v1082_v7  ;;  %v1085_v12 = vld [vmem:[#allocation7 + $0x18] sm:$0xff]   ;;  %v1076_v15 = vld [vmem:[#allocation2 + $0x10] sm:$0xff]   ;;  %v1078_v17 = vld [vmem:[#allocation2 + $0x20] sm:$0xff]  }
  0x4f   :  { %948 = vmatpush3.bf16.msra.mxu0 %v1067_v1  ;;  %979 = vmatprep.subr.bf16.mxu1 %v1083_v8  ;;  %v1077_v16 = vld [vmem:[#allocation2 + $0x18] sm:$0xff]   ;;  %v1079_v18 = vld [vmem:[#allocation2 + $0x28] sm:$0xff]   ;;  %v1080_v19 = vld [vmem:[#allocation2 + $0x30] sm:$0xff]  }
  0x50   :  { %949 = vmatprep.subr.bf16.mxu0 %v1068_v2  ;;  %v1081_v20 = vld [vmem:[#allocation2 + $0x38] sm:$0xff]   ;;  %v1087_v21 = vld [vmem:[#allocation7 + $0x28] sm:$0xff]   ;;  %v1088_v22 = vld [vmem:[#allocation7 + $0x30] sm:$0xff]  }
  0x51   :  { %v1089_v23 = vld [vmem:[#allocation7 + $0x38] sm:$0xff]   ;;  %v1090_v24 = vld [vmem:[#allocation8] sm:$0xff]   ;;  %v1091_v25 = vld [vmem:[#allocation8 + $0x8] sm:$0xff]  }
  0x52   :  { %980 = vmatpush3.bf16.msra.mxu1 %v1083_v8  ;;  %v1403_v26 = vld [vmem:[#allocation8 + $0x10] sm:$0xff]   ;;  %v1406_v27 = vld [vmem:[#allocation8 + $0x18] sm:$0xff]   ;;  %v1410_v28 = vld [vmem:[#allocation8 + $0x20] sm:$0xff]  }
  0x53   :  { %950 = vmatpush3.bf16.msra.mxu0 %v1068_v2  ;;  %981 = vmatprep.subr.bf16.mxu1 %v1084_v10  ;;  %v1418_v29 = vld [vmem:[%s1498_s2] ss:$0 sm:$0xff] }
  0x54   :  { %951 = vmatprep.subr.bf16.mxu0 %v1069_v3 }
  0x56   :  { %982 = vmatpush3.bf16.msra.mxu1 %v1084_v10 }
  0x57   :  { %952 = vmatpush3.bf16.msra.mxu0 %v1069_v3  ;;  %983 = vmatprep.subr.bf16.mxu1 %v1085_v12 }
  0x58   :  { %953 = vmatprep.subr.bf16.mxu0 %v1070_v5 }
  0x5a   :  { %984 = vmatpush3.bf16.msra.mxu1 %v1085_v12 }
  0x5b   :  { %954 = vmatpush3.bf16.msra.mxu0 %v1070_v5  ;;  %985 = vmatprep.subr.bf16.mxu1 %v1086_v13 }
  0x5c   :  { %955 = vmatprep.subr.bf16.mxu0 %v1071_v6 }
  0x5e   :  { %986 = vmatpush3.bf16.msra.mxu1 %v1086_v13 }
  0x5f   :  { %956 = vmatpush3.bf16.msra.mxu0 %v1071_v6  ;;  %987 = vmatprep.subr.bf16.mxu1 %v1087_v21 }
  0x60   :  { %957 = vmatprep.subr.bf16.mxu0 %v1072_v9 }
  0x62   :  { %988 = vmatpush3.bf16.msra.mxu1 %v1087_v21 }
  0x63   :  { %958 = vmatpush3.bf16.msra.mxu0 %v1072_v9  ;;  %989 = vmatprep.subr.bf16.mxu1 %v1088_v22 }
  0x64   :  { %959 = vmatprep.subr.bf16.mxu0 %v1073_v11 }
  0x66   :  { %990 = vmatpush3.bf16.msra.mxu1 %v1088_v22 }
  0x67   :  { %960 = vmatpush3.bf16.msra.mxu0 %v1073_v11  ;;  %991 = vmatprep.subr.bf16.mxu1 %v1089_v23 }
  0x68   :  { %1009 = vmatprep.subr.bf16.mxu0 %v1090_v24 }
  0x6a   :  { %962 = vmatmul.mubr.bf16.vlgmr.msra.gmra.mrb[0].mxu0 %v1075_v14  ;;  %992 = vmatpush3.bf16.msra.mxu1 %v1089_v23 }
  0x6b   :  { %965 = vmatprep.mubr.bf16.mxu0 %v1076_v15  ;;  %1041 = vmatprep.subr.bf16.mxu1 %v1090_v24 }
  0x6c   :  { %1010 = vmatpush3.bf16.msra.mxu0 %v1090_v24 }
  0x6d   :  { %1011 = vmatprep.subr.bf16.mxu0 %v1091_v25 }
  0x70   :  { %1012 = vmatpush3.bf16.msra.mxu0 %v1091_v25 }
  0x71   :  { %1013 = vmatprep.subr.bf16.mxu0 %v1403_v26 }
  0x72   :  { %966 = vmatmul.mubr.bf16.gmra.mrb[4].mxu0 %v1077_v16 }
  0x73   :  { %969 = vmatprep.mubr.bf16.mxu0 %v1078_v17 }
  0x74   :  { %1014 = vmatpush3.bf16.msra.mxu0 %v1403_v26 }
  0x75   :  { %1015 = vmatprep.subr.bf16.mxu0 %v1406_v27 }
  0x78   :  { %1016 = vmatpush3.bf16.msra.mxu0 %v1406_v27 }
  0x79   :  { %1017 = vmatprep.subr.bf16.mxu0 %v1410_v28 }
  0x7a   :  { %970 = vmatmul.mubr.bf16.gmra.mrb[8].mxu0 %v1079_v18 }
  0x7b   :  { %973 = vmatprep.mubr.bf16.mxu0 %v1080_v19 }
  0x7c   :  { %1018 = vmatpush3.bf16.msra.mxu0 %v1410_v28 }
  0x82   :  { %974 = vmatmul.mubr.bf16.gmra.mrb[12].mxu0 %v1081_v20 }
 0x13d   :  { %v963_v30 = vpop.f32.mrb[0].mxu0 }
 0x13e   :  { %v261_v31 = vadd.f32 %v963_v30, %v1418_v29  ;;  %v252_v32 = vpop.f32.mrb[1].mxu0 }
 0x13f   :  { %v253_v33 = vadd.f32 %v1418_v29, %v252_v32  ;;  %v964_v34 = vpop.f32.mrb[2].mxu0 }
 0x140   :  { %v317_v35 = vmul.f32 0.2, %v261_v31  ;;  %v264_v36 = vadd.f32 %v964_v34, %v1418_v29  ;;  %v255_v37 = vpop.f32.mrb[3].mxu0 }
 0x141   :  { %v315_v38 = vmul.f32 0.2, %v253_v33  ;;  %v256_v39 = vadd.f32 %v1418_v29, %v255_v37 }
 0x142   :  { %v318_v40 = vmul.f32 0.2, %v264_v36  ;;  %v333_v42 = vmax.f32 %v261_v31, %v317_v35 }
 0x143   :  { %v316_v41 = vmul.f32 0.2, %v256_v39  ;;  %v331_v45 = vmax.f32 %v253_v33, %v315_v38 }
 0x144   :  { %v334_v43 = vmax.f32 %v264_v36, %v318_v40  ;;  %v1095_v40 = vld [vmem:[#allocation8 + $0x28] sm:$0xff]  }
 0x145   :  { %v967_v44 = vpop.f32.mrb[4].mxu0  ;;  %v332_v46 = vmax.f32 %v256_v39, %v316_v41  ;;  %1019 = vmatprep.subr.bf16.mxu0 %v1095_v40  ;;  %v1097_v41 = vld [vmem:[#allocation8 + $0x38] sm:$0xff]  }
 0x146   :  { %v277_v47 = vadd.f32 %v967_v44, %v1418_v29  ;;  %v268_v48 = vpop.f32.mrb[5].mxu0  ;;  %v348_v49 = vpack.c.bf16 %v334_v43, %v333_v42  ;;  %1020 = vmatpush3.bf16.msra.mxu0 %v1095_v40 }
 0x147   :  { %v269_v50 = vadd.f32 %v1418_v29, %v268_v48  ;;  %v968_v51 = vpop.f32.mrb[6].mxu0  ;;  %v347_v52 = vpack.c.bf16 %v332_v46, %v331_v45 }
 0x148   :  { %v321_v53 = vmul.f32 0.2, %v277_v47  ;;  %v280_v54 = vadd.f32 %v968_v51, %v1418_v29  ;;  %v271_v55 = vpop.f32.mrb[7].mxu0 }
 0x149   :  { %v319_v56 = vmul.f32 0.2, %v269_v50  ;;  %v272_v57 = vadd.f32 %v1418_v29, %v271_v55  ;;  %993 = vmatprep.mubr.bf16.mxu1 %v347_v52 }
 0x14a   :  { %v322_v58 = vmul.f32 0.2, %v280_v54  ;;  %994 = vmatmul.mubr.bf16.vlgmr.msra.gmra.mrb[0].mxu1 %v348_v49  ;;  %v337_v60 = vmax.f32 %v277_v47, %v321_v53 }
 0x14b   :  { %v320_v59 = vmul.f32 0.2, %v272_v57  ;;  %1049 = vmatpush3.bf16.msra.mxu1 %v1090_v24  ;;  %v335_v62 = vmax.f32 %v269_v50, %v319_v56 }
 0x14c   :  { %v338_v61 = vmax.f32 %v280_v54, %v322_v58  ;;  %1042 = vmatprep.subr.bf16.mxu1 %v1091_v25 }
 0x14d   :  { %v336_v63 = vmax.f32 %v272_v57, %v320_v59  ;;  %v971_v0 = vpop.f32.mrb[8].mxu0 }
 0x14e   :  { %v293_v1 = vadd.f32 %v971_v0, %v1418_v29  ;;  %v284_v2 = vpop.f32.mrb[9].mxu0  ;;  %v350_v3 = vpack.c.bf16 %v338_v61, %v337_v60 }
 0x14f   :  { %v285_v4 = vadd.f32 %v1418_v29, %v284_v2  ;;  %v972_v5 = vpop.f32.mrb[10].mxu0  ;;  %v349_v6 = vpack.c.bf16 %v336_v63, %v335_v62  ;;  %1050 = vmatpush3.bf16.msra.mxu1 %v1091_v25 }
 0x150   :  { %v325_v7 = vmul.f32 0.2, %v293_v1  ;;  %v296_v8 = vadd.f32 %v972_v5, %v1418_v29  ;;  %v287_v9 = vpop.f32.mrb[11].mxu0  ;;  %1043 = vmatprep.subr.bf16.mxu1 %v1403_v26 }
 0x151   :  { %v323_v10 = vmul.f32 0.2, %v285_v4  ;;  %v288_v11 = vadd.f32 %v1418_v29, %v287_v9  ;;  %997 = vmatprep.mubr.bf16.mxu1 %v349_v6 }
 0x152   :  { %v326_v12 = vmul.f32 0.2, %v296_v8  ;;  %998 = vmatmul.mubr.bf16.gmra.mrb[4].mxu1 %v350_v3  ;;  %v341_v14 = vmax.f32 %v293_v1, %v325_v7 }
 0x153   :  { %v324_v13 = vmul.f32 0.2, %v288_v11  ;;  %1051 = vmatpush3.bf16.msra.mxu1 %v1403_v26  ;;  %v339_v16 = vmax.f32 %v285_v4, %v323_v10 }
 0x154   :  { %v342_v15 = vmax.f32 %v296_v8, %v326_v12  ;;  %1044 = vmatprep.subr.bf16.mxu1 %v1406_v27 }
 0x155   :  { %v340_v17 = vmax.f32 %v288_v11, %v324_v13  ;;  %v975_v18 = vpop.f32.mrb[12].mxu0 }
 0x156   :  { %v309_v19 = vadd.f32 %v975_v18, %v1418_v29  ;;  %v300_v20 = vpop.f32.mrb[13].mxu0  ;;  %v352_v21 = vpack.c.bf16 %v342_v15, %v341_v14 }
 0x157   :  { %v301_v22 = vadd.f32 %v1418_v29, %v300_v20  ;;  %v976_v23 = vpop.f32.mrb[14].mxu0  ;;  %v351_v24 = vpack.c.bf16 %v340_v17, %v339_v16  ;;  %1052 = vmatpush3.bf16.msra.mxu1 %v1406_v27 }
 0x158   :  { %v329_v25 = vmul.f32 0.2, %v309_v19  ;;  %v312_v26 = vadd.f32 %v976_v23, %v1418_v29  ;;  %v303_v30 = vpop.f32.mrb[15].mxu0  ;;  %1045 = vmatprep.subr.bf16.mxu1 %v1410_v28 }
 0x159   :  { %v327_v31 = vmul.f32 0.2, %v301_v22  ;;  %v304_v32 = vadd.f32 %v1418_v29, %v303_v30  ;;  %1001 = vmatprep.mubr.bf16.mxu1 %v351_v24  ;;  %v1096_v29 = vld [vmem:[#allocation8 + $0x30] sm:$0xff]  }
 0x15a   :  { %v330_v33 = vmul.f32 0.2, %v312_v26  ;;  %1002 = vmatmul.mubr.bf16.gmra.mrb[8].mxu1 %v352_v21  ;;  %v345_v35 = vmax.f32 %v309_v19, %v329_v25  ;;  %1021 = vmatprep.subr.bf16.mxu0 %v1096_v29 }
 0x15b   :  { %v328_v34 = vmul.f32 0.2, %v304_v32  ;;  %1053 = vmatpush3.bf16.msra.mxu1 %v1410_v28  ;;  %v343_v37 = vmax.f32 %v301_v22, %v327_v31  ;;  %1022 = vmatpush3.bf16.msra.mxu0 %v1096_v29  ;;  %v1445_v28 = vld [vmem:[%s1500_s4] ss:$0 sm:$0xff] }
 0x15c   :  { %v346_v36 = vmax.f32 %v312_v26, %v330_v33  ;;  %1046 = vmatprep.subr.bf16.mxu1 %v1095_v40  ;;  %1023 = vmatprep.subr.bf16.mxu0 %v1097_v41 }
 0x15d   :  { %v344_v38 = vmax.f32 %v304_v32, %v328_v34 }
 0x15e   :  { %v354_v27 = vpack.c.bf16 %v346_v36, %v345_v35 }
 0x15f   :  { %v353_v39 = vpack.c.bf16 %v344_v38, %v343_v37  ;;  %1054 = vmatpush3.bf16.msra.mxu1 %v1095_v40  ;;  %1024 = vmatpush3.bf16.msra.mxu0 %v1097_v41 }
 0x160   :  { %1047 = vmatprep.subr.bf16.mxu1 %v1096_v29 }
 0x161   :  { %1005 = vmatprep.mubr.bf16.mxu1 %v353_v39 }
 0x162   :  { %1006 = vmatmul.mubr.bf16.gmra.mrb[12].mxu1 %v354_v27 }
 0x163   :  { %1055 = vmatpush3.bf16.msra.mxu1 %v1096_v29 }
 0x164   :  { %1048 = vmatprep.subr.bf16.mxu1 %v1097_v41 }
 0x167   :  { %1056 = vmatpush3.bf16.msra.mxu1 %v1097_v41 }
 0x21d   :  { %v995_v42 = vpop.f32.mrb[0].mxu1 }
 0x21e   :  { %v469_v43 = vadd.f32 %v995_v42, %v1445_v28  ;;  %v460_v44 = vpop.f32.mrb[1].mxu1 }
 0x21f   :  { %v461_v45 = vadd.f32 %v1445_v28, %v460_v44  ;;  %v996_v46 = vpop.f32.mrb[2].mxu1 }
 0x220   :  { %v525_v47 = vmul.f32 0.2, %v469_v43  ;;  %v472_v48 = vadd.f32 %v996_v46, %v1445_v28  ;;  %v463_v49 = vpop.f32.mrb[3].mxu1 }
 0x221   :  { %v523_v50 = vmul.f32 0.2, %v461_v45  ;;  %v464_v51 = vadd.f32 %v1445_v28, %v463_v49 }
 0x222   :  { %v526_v52 = vmul.f32 0.2, %v472_v48  ;;  %v541_v54 = vmax.f32 %v469_v43, %v525_v47 }
 0x223   :  { %v524_v53 = vmul.f32 0.2, %v464_v51  ;;  %v539_v56 = vmax.f32 %v461_v45, %v523_v50 }
 0x224   :  { %v542_v55 = vmax.f32 %v472_v48, %v526_v52 }
 0x225   :  { %v540_v57 = vmax.f32 %v464_v51, %v524_v53  ;;  %v999_v58 = vpop.f32.mrb[4].mxu1  ;;  %v1466_v51 = vld [vmem:[%s1502_s6] ss:$0 sm:$0xff]  ;;  %s1286_s6 = smov [#allocation10]  }
 0x226   :  { %v556_v59 = vpack.c.bf16 %v542_v55, %v541_v54  ;;  %v485_v60 = vadd.f32 %v999_v58, %v1445_v28  ;;  %v476_v61 = vpop.f32.mrb[5].mxu1  ;;  %s848_s28 = sshll.u32 %s1286_s6, 4  ;;  %s849_s28 = int_to_ptr.vmem [resolvable:$true] %s848_s28 }
 0x227   :  { %v477_v62 = vadd.f32 %v1445_v28, %v476_v61  ;;  %v1000_v63 = vpop.f32.mrb[6].mxu1  ;;  %v555_v0 = vpack.c.bf16 %v540_v57, %v539_v56  ;;  %s1250_s29 = scalar_lea.vmem %s849_s28, 2048  ;;  %p1255_p5 = scmp.lt.s32.totalorder %s849_s28, %s849_s28 }
 0x228   :  { %v529_v1 = vmul.f32 0.2, %v485_v60  ;;  %v488_v2 = vadd.f32 %v1000_v63, %v1445_v28  ;;  %v479_v3 = vpop.f32.mrb[7].mxu1  ;;  %p1251_p4 = scmp.ne.s32.totalorder %s849_s28, %s1250_s29  ;;  %p1256_p6 = scmp.lt.s32.totalorder %s1250_s29, %s1250_s29 }
 0x229   :  { %v527_v4 = vmul.f32 0.2, %v477_v62  ;;  %v480_v5 = vadd.f32 %v1445_v28, %v479_v3  ;;  %1025 = vmatprep.mubr.bf16.mxu0 %v555_v0 }
 0x22a   :  { %v530_v6 = vmul.f32 0.2, %v488_v2  ;;  %1026 = vmatmul.mubr.bf16.vlgmr.msra.gmra.mrb[16].mxu0 %v556_v59  ;;  %v545_v8 = vmax.f32 %v485_v60, %v529_v1  ;;  %p1257_p7 = por %p1256_p6, %p1255_p5 }
 0x22b   :  { %v528_v7 = vmul.f32 0.2, %v480_v5  ;;  %v543_v10 = vmax.f32 %v477_v62, %v527_v4 }
 0x22c   :  { %v546_v9 = vmax.f32 %v488_v2, %v530_v6  ;;  %p1258_p8 = pnand %p1257_p7, %p1251_p4 }
 0x22d   :  { %v544_v11 = vmax.f32 %v480_v5, %v528_v7  ;;  %v1003_v12 = vpop.f32.mrb[8].mxu1 }
 0x22e   :  { %v501_v13 = vadd.f32 %v1003_v12, %v1445_v28  ;;  %v492_v14 = vpop.f32.mrb[9].mxu1  ;;  %v558_v15 = vpack.c.bf16 %v546_v9, %v545_v8 }
 0x22f   :  { %v493_v16 = vadd.f32 %v1445_v28, %v492_v14  ;;  %v1004_v17 = vpop.f32.mrb[10].mxu1  ;;  %v557_v18 = vpack.c.bf16 %v544_v11, %v543_v10 }
 0x230   :  { %v533_v19 = vmul.f32 0.2, %v501_v13  ;;  %v504_v20 = vadd.f32 %v1004_v17, %v1445_v28  ;;  %v495_v21 = vpop.f32.mrb[11].mxu1 }
 0x231   :  { %v531_v22 = vmul.f32 0.2, %v493_v16  ;;  %v496_v23 = vadd.f32 %v1445_v28, %v495_v21  ;;  %1029 = vmatprep.mubr.bf16.mxu0 %v557_v18 }
 0x232   :  { %v534_v24 = vmul.f32 0.2, %v504_v20  ;;  %1030 = vmatmul.mubr.bf16.gmra.mrb[20].mxu0 %v558_v15  ;;  %v549_v26 = vmax.f32 %v501_v13, %v533_v19 }
 0x233   :  { %v532_v25 = vmul.f32 0.2, %v496_v23  ;;  %v547_v31 = vmax.f32 %v493_v16, %v531_v22 }
 0x234   :  { %v550_v30 = vmax.f32 %v504_v20, %v534_v24 }
 0x235   :  { %v548_v32 = vmax.f32 %v496_v23, %v532_v25  ;;  %v1007_v33 = vpop.f32.mrb[12].mxu1 }
 0x236   :  { %v560_v34 = vpack.c.bf16 %v550_v30, %v549_v26  ;;  %v517_v35 = vadd.f32 %v1007_v33, %v1445_v28  ;;  %v508_v36 = vpop.f32.mrb[13].mxu1 }
 0x237   :  { %v509_v37 = vadd.f32 %v1445_v28, %v508_v36  ;;  %v1008_v38 = vpop.f32.mrb[14].mxu1  ;;  %v559_v27 = vpack.c.bf16 %v548_v32, %v547_v31 }
 0x238   :  { %v537_v39 = vmul.f32 0.2, %v517_v35  ;;  %v520_v40 = vadd.f32 %v1008_v38, %v1445_v28  ;;  %v511_v29 = vpop.f32.mrb[15].mxu1 }
 0x239   :  { %v535_v41 = vmul.f32 0.2, %v509_v37  ;;  %v512_v42 = vadd.f32 %v1445_v28, %v511_v29  ;;  %1033 = vmatprep.mubr.bf16.mxu1 %v559_v27 }
 0x23a   :  { %v538_v43 = vmul.f32 0.2, %v520_v40  ;;  %1034 = vmatmul.mubr.bf16.vlgmr.msra.gmra.mrb[16].mxu1 %v560_v34  ;;  %v553_v45 = vmax.f32 %v517_v35, %v537_v39 }
 0x23b   :  { %v536_v44 = vmul.f32 0.2, %v512_v42  ;;  %v551_v47 = vmax.f32 %v509_v37, %v535_v41 }
 0x23c   :  { %v554_v46 = vmax.f32 %v520_v40, %v538_v43 }
 0x23d   :  { %v552_v48 = vmax.f32 %v512_v42, %v536_v44 }
 0x23e   :  { %v562_v49 = vpack.c.bf16 %v554_v46, %v553_v45 }
 0x23f   :  { %v561_v50 = vpack.c.bf16 %v552_v48, %v551_v47 }
 0x241   :  { %1037 = vmatprep.mubr.bf16.mxu1 %v561_v50 }
 0x242   :  { %1038 = vmatmul.mubr.bf16.gmra.mrb[20].mxu1 %v562_v49 }
 0x2fd   :  { %v1027_v52 = vpop.f32.mrb[16].mxu0 }
 0x2fe   :  { %v677_v28 = vadd.f32 %v1027_v52, %v1466_v51  ;;  %v668_v53 = vpop.f32.mrb[17].mxu0 }
 0x2ff   :  { %v669_v54 = vadd.f32 %v1466_v51, %v668_v53  ;;  %v1028_v55 = vpop.f32.mrb[18].mxu0 }
 0x300   :  { %v733_v56 = vsub.f32 0.0, %v677_v28  ;;  %v680_v57 = vadd.f32 %v1028_v55, %v1466_v51  ;;  %v671_v58 = vpop.f32.mrb[19].mxu0 }
 0x301   :  { %v731_v59 = vsub.f32 0.0, %v669_v54  ;;  %v672_v60 = vadd.f32 %v1466_v51, %v671_v58 }
 0x302   :  { %v751_v61 = vmul.f32 1.442695, %v733_v56  ;;  %v734_v62 = vsub.f32 0.0, %v680_v57 }
 0x303   :  { %v747_v63 = vmul.f32 1.442695, %v731_v59  ;;  %v732_v0 = vsub.f32 0.0, %v672_v60 }
 0x304   :  { %1098 = vpow2.f32 %v751_v61  ;;  %v753_v1 = vmul.f32 1.442695, %v734_v62 }
 0x305   :  { %1100 = vpow2.f32 %v747_v63  ;;  %v749_v2 = vmul.f32 1.442695, %v732_v0  ;;  %v1031_v3 = vpop.f32.mrb[20].mxu0 }
 0x306   :  { %1102 = vpow2.f32 %v753_v1  ;;  %v693_v4 = vadd.f32 %v1031_v3, %v1466_v51  ;;  %v684_v5 = vpop.f32.mrb[21].mxu0 }
 0x307   :  { %1104 = vpow2.f32 %v749_v2  ;;  %v685_v6 = vadd.f32 %v1466_v51, %v684_v5  ;;  %v1032_v7 = vpop.f32.mrb[22].mxu0 }
 0x308   :  { %v737_v8 = vsub.f32 0.0, %v693_v4  ;;  %v696_v9 = vadd.f32 %v1032_v7, %v1466_v51  ;;  %v687_v10 = vpop.f32.mrb[23].mxu0 }
 0x309   :  { %v735_v11 = vsub.f32 0.0, %v685_v6  ;;  %v688_v12 = vadd.f32 %v1466_v51, %v687_v10 }
 0x30a   :  { %v759_v13 = vmul.f32 1.442695, %v737_v8  ;;  %v738_v14 = vsub.f32 0.0, %v696_v9 }
 0x30b   :  { %v755_v15 = vmul.f32 1.442695, %v735_v11  ;;  %v736_v16 = vsub.f32 0.0, %v688_v12 }
 0x30c   :  { %1106 = vpow2.f32 %v759_v13  ;;  %v761_v17 = vmul.f32 1.442695, %v738_v14 }
 0x30d   :  { %1108 = vpow2.f32 %v755_v15  ;;  %v757_v18 = vmul.f32 1.442695, %v736_v16  ;;  %v1035_v19 = vpop.f32.mrb[16].mxu1 }
 0x30e   :  { %v1099_v20 = vpop.eup %1098  ;;  %1110 = vpow2.f32 %v761_v17  ;;  %v709_v21 = vadd.f32 %v1035_v19, %v1466_v51  ;;  %v700_v22 = vpop.f32.mrb[17].mxu1 }
 0x30f   :  { %v1101_v23 = vpop.eup %1100  ;;  %v781_v24 = vadd.f32 1.0, %v1099_v20  ;;  %1112 = vpow2.f32 %v757_v18  ;;  %v701_v25 = vadd.f32 %v1466_v51, %v700_v22  ;;  %v1036_v26 = vpop.f32.mrb[18].mxu1 }
 0x310   :  { %v1103_v30 = vpop.eup %1102  ;;  %v779_v31 = vadd.f32 1.0, %v1101_v23  ;;  %v741_v32 = vsub.f32 0.0, %v709_v21  ;;  %v712_v33 = vadd.f32 %v1036_v26, %v1466_v51  ;;  %v703_v34 = vpop.f32.mrb[19].mxu1 }
 0x311   :  { %v1105_v35 = vpop.eup %1104  ;;  %1114 = vrcp.f32 %v781_v24  ;;  %v782_v36 = vadd.f32 1.0, %v1103_v30  ;;  %v739_v37 = vsub.f32 0.0, %v701_v25  ;;  %v704_v38 = vadd.f32 %v1466_v51, %v703_v34 }
 0x312   :  { %1116 = vrcp.f32 %v779_v31  ;;  %v780_v27 = vadd.f32 1.0, %v1105_v35  ;;  %v767_v39 = vmul.f32 1.442695, %v741_v32  ;;  %v742_v40 = vsub.f32 0.0, %v712_v33 }
 0x313   :  { %1118 = vrcp.f32 %v782_v36  ;;  %v763_v29 = vmul.f32 1.442695, %v739_v37  ;;  %v740_v41 = vsub.f32 0.0, %v704_v38 }
 0x314   :  { %1120 = vrcp.f32 %v780_v27  ;;  %v769_v42 = vmul.f32 1.442695, %v742_v40 }
 0x315   :  { %1122 = vpow2.f32 %v767_v39  ;;  %v765_v43 = vmul.f32 1.442695, %v740_v41  ;;  %v1039_v44 = vpop.f32.mrb[20].mxu1 }
 0x316   :  { %v1107_v45 = vpop.eup %1106  ;;  %1124 = vpow2.f32 %v763_v29  ;;  %v725_v46 = vadd.f32 %v1039_v44, %v1466_v51  ;;  %v716_v47 = vpop.f32.mrb[21].mxu1 }
 0x317   :  { %v1109_v48 = vpop.eup %1108  ;;  %v785_v49 = vadd.f32 1.0, %v1107_v45  ;;  %1126 = vpow2.f32 %v769_v42  ;;  %v717_v50 = vadd.f32 %v1466_v51, %v716_v47  ;;  %v1040_v52 = vpop.f32.mrb[22].mxu1 }
 0x318   :  { %v1111_v28 = vpop.eup %1110  ;;  %v783_v53 = vadd.f32 1.0, %v1109_v48  ;;  %1128 = vpow2.f32 %v765_v43  ;;  %v745_v54 = vsub.f32 0.0, %v725_v46  ;;  %v728_v55 = vadd.f32 %v1040_v52, %v1466_v51  ;;  %v719_v56 = vpop.f32.mrb[23].mxu1 }
 0x319   :  { %v1113_v57 = vpop.eup %1112  ;;  %1130 = vrcp.f32 %v785_v49  ;;  %v786_v58 = vadd.f32 1.0, %v1111_v28  ;;  %v743_v59 = vsub.f32 0.0, %v717_v50  ;;  %v720_v60 = vadd.f32 %v1466_v51, %v719_v56 }
 0x31a   :  { %1132 = vrcp.f32 %v783_v53  ;;  %v784_v61 = vadd.f32 1.0, %v1113_v57  ;;  %v775_v62 = vmul.f32 1.442695, %v745_v54  ;;  %v746_v63 = vsub.f32 0.0, %v728_v55 }
 0x31b   :  { %v1115_v0 = vpop.eup %1114  ;;  %1134 = vrcp.f32 %v786_v58  ;;  %v771_v1 = vmul.f32 1.442695, %v743_v59  ;;  %v744_v2 = vsub.f32 0.0, %v720_v60 }
 0x31c   :  { %v1117_v3 = vpop.eup %1116  ;;  %829 = vst [vmem:[#allocation10 + $0x10] sm:$0xff] %v1115_v0  ;;  %1136 = vrcp.f32 %v784_v61  ;;  %v777_v4 = vmul.f32 1.442695, %v746_v63 }
 0x31d   :  { %v1119_v5 = vpop.eup %1118  ;;  %827 = vst [vmem:[#allocation10] sm:$0xff] %v1117_v3  ;;  %1138 = vpow2.f32 %v775_v62  ;;  %v773_v6 = vmul.f32 1.442695, %v744_v2 }
 0x31e   :  { %v1121_v7 = vpop.eup %1120  ;;  %830 = vst [vmem:[#allocation10 + $0x18] sm:$0xff] %v1119_v5  ;;  %1140 = vpow2.f32 %v771_v1 }
 0x31f   :  { %v1123_v51 = vpop.eup %1122  ;;  %828 = vst [vmem:[#allocation10 + $0x8] sm:$0xff] %v1121_v7  ;;  %1142 = vpow2.f32 %v777_v4 }
 0x320   :  { %v1125_v8 = vpop.eup %1124  ;;  %v789_v9 = vadd.f32 1.0, %v1123_v51  ;;  %1144 = vpow2.f32 %v773_v6 }
 0x321   :  { %v1127_v10 = vpop.eup %1126  ;;  %v787_v11 = vadd.f32 1.0, %v1125_v8 }
 0x322   :  { %v1129_v12 = vpop.eup %1128  ;;  %1146 = vrcp.f32 %v789_v9  ;;  %v790_v13 = vadd.f32 1.0, %v1127_v10 }
 0x323   :  { %v1131_v14 = vpop.eup %1130  ;;  %1148 = vrcp.f32 %v787_v11  ;;  %v788_v15 = vadd.f32 1.0, %v1129_v12 }
 0x324   :  { %v1133_v16 = vpop.eup %1132  ;;  %833 = vst [vmem:[#allocation10 + $0x30] sm:$0xff] %v1131_v14  ;;  %1150 = vrcp.f32 %v790_v13 }
 0x325   :  { %v1135_v17 = vpop.eup %1134  ;;  %831 = vst [vmem:[#allocation10 + $0x20] sm:$0xff] %v1133_v16  ;;  %1152 = vrcp.f32 %v788_v15 }
 0x326   :  { %v1137_v18 = vpop.eup %1136  ;;  %834 = vst [vmem:[#allocation10 + $0x38] sm:$0xff] %v1135_v17 }
 0x327   :  { %v1139_v19 = vpop.eup %1138  ;;  %832 = vst [vmem:[#allocation10 + $0x28] sm:$0xff] %v1137_v18 }
 0x328   :  { %v1141_v20 = vpop.eup %1140  ;;  %v793_v21 = vadd.f32 1.0, %v1139_v19 }
 0x329   :  { %v1143_v22 = vpop.eup %1142  ;;  %v791_v23 = vadd.f32 1.0, %v1141_v20 }
 0x32a   :  { %v1145_v24 = vpop.eup %1144  ;;  %1154 = vrcp.f32 %v793_v21  ;;  %v794_v25 = vadd.f32 1.0, %v1143_v22 }
 0x32b   :  { %1156 = vrcp.f32 %v791_v23  ;;  %v792_v26 = vadd.f32 1.0, %v1145_v24 }
 0x32c   :  { %v1147_v30 = vpop.eup %1146  ;;  %1158 = vrcp.f32 %v794_v25 }
 0x32d   :  { %v1149_v31 = vpop.eup %1148  ;;  %837 = vst [vmem:[#allocation10 + $0x50] sm:$0xff] %v1147_v30  ;;  %1160 = vrcp.f32 %v792_v26 }
 0x32e   :  { %v1151_v32 = vpop.eup %1150  ;;  %835 = vst [vmem:[#allocation10 + $0x40] sm:$0xff] %v1149_v31 }
 0x32f   :  { %v1153_v33 = vpop.eup %1152  ;;  %838 = vst [vmem:[#allocation10 + $0x58] sm:$0xff] %v1151_v32 }
 0x330   :  { %836 = vst [vmem:[#allocation10 + $0x48] sm:$0xff] %v1153_v33 }
 0x334   :  { %v1155_v34 = vpop.eup %1154 }
 0x335   :  { %v1157_v35 = vpop.eup %1156  ;;  %841 = vst [vmem:[#allocation10 + $0x70] sm:$0xff] %v1155_v34 }
 0x336   :  { %v1159_v36 = vpop.eup %1158  ;;  %839 = vst [vmem:[#allocation10 + $0x60] sm:$0xff] %v1157_v35 }
 0x337   :  { %v1161_v37 = vpop.eup %1160  ;;  %842 = vst [vmem:[#allocation10 + $0x78] sm:$0xff] %v1159_v36 }
 0x338   :  { %840 = vst [vmem:[#allocation10 + $0x68] sm:$0xff] %v1161_v37 }
 0x339   :  { %1261 = shalt.err (!%p1258_p8)
}
 0x33a   :  { %s1262_s9 = scalar_lea.hbm %s1503_s7, 2048 }
 0x33b   :  { %p1263_p9 = scmp.ne.s32.totalorder %s1503_s7, %s1262_s9  ;;  %p1266_p10 = scmp.lt.u32.totalorder %s1262_s9, %s1503_s7 }
 0x33d   :  { %p1268_p11 = pnand %p1266_p10, %p1263_p9 }
 0x33f   :  { %1271 = shalt.err (!%p1268_p11)
}
 0x340   :  { %s1287_s16 = smov 128   ;;  %s1288_s0 = smov 8  }
 0x341   :  { %854 = dma.vmem_to_hbm [thread:$0]  %s849_s28, 2048, %s1503_s7, [#allocation4], %s1287_s16, %s1287_s16, %s1288_s0  }
 0x342   :  { %1278 = dma.done.wait [#allocation4], 2048  }
 0x343   :  { %1279 = vsyncadd [#allocation4], 4294965248 }
 0x344   :  { %858 = vsyncpa [#allocation3], 1 }
 0x345   :  { %859 = vsyncpa [#allocation6], 1 }
 0x346   :  { %860 = vsyncpa [#allocation9], 1 }
 0x347   :  { %861 = vsyncpa [#allocation4], 1 }

</bundles_post_ra>
